<compile_context>
chip_gen: v5e
topology: v5e:2x2
jax: 0.10.0
libtpu: 0.0.40
codegen_flags: <defaults>
</compile_context>

<pallas_src>
import functools

import jax
import jax.numpy as jnp
from jax.experimental import pallas as pl
from jax.experimental.pallas import tpu as pltpu

HIDDEN = 32  # fixed by the module


def _lstm_price_kernel(x_ref, w_ih0_ref, b0_ref, w_cat_ref, b1_ref,
                       w_lin_ref, b_lin_ref, y_ref,
                       pred_ref, loss_ref, *, b_real):
    """Fused 2-layer LSTM recurrence + Linear head + masked MSE loss.

    Gate columns arrive pre-permuted to [i, f, o, g] so one sigmoid covers a
    contiguous (B, 3H) slice and one tanh covers the trailing (B, H) slice.

    x_ref:   (T*Bp, D)  time-major flattened, batch padded to Bp=8
    w_ih0:   (D, 4H)    b0: (1, 4H)        (b_ih + b_hh, permuted)
    w_cat:   (2H, 8H)   bf16; rows 0:H = [w_ih1 | w_hh0], rows H:2H = [w_hh1 | 0]
    b1:      (1, 4H)
    w_lin:   (H, out)   b_lin: (1, out)
    y_ref:   (Bp, out)  targets (rows >= b_real are zero padding)
    pred_ref:(Bp, out)  predictions        loss_ref: (1, 1) scalar MSE
    """
    H = HIDDEN
    G = 4 * H
    Bp = y_ref.shape[0]
    T = x_ref.shape[0] // Bp
    OUT = y_ref.shape[1]

    # ---- hoist every weight / bias load out of the (unrolled) recurrence ----
    w_cat = w_cat_ref[...]                            # (2H, 8H) bf16, stays resident
    b1 = jnp.broadcast_to(b1_ref[...], (Bp, G))       # broadcast once, not per step

    # ---- time-parallel part of layer 0: one big matmul before the recurrence ----
    xproj = (jnp.dot(x_ref[...], w_ih0_ref[...],
                     preferred_element_type=jnp.float32)
             + b0_ref[...])                           # (T*Bp, 4H)

    def cell(gates, c):
        sig = jax.nn.sigmoid(gates[:, :3 * H])        # i | f | o in one EUP pass
        g = jnp.tanh(gates[:, 3 * H:])                # g in one EUP pass
        i_g = sig[:, :H]
        f_g = sig[:, H:2 * H]
        o_g = sig[:, 2 * H:3 * H]
        c_new = f_g * c + i_g * g
        h_new = o_g * jnp.tanh(c_new)
        return h_new, c_new

    zeros = jnp.zeros((Bp, H), jnp.float32)           # hidden_cell defaults to zeros
    c0 = h1 = c1 = zeros
    rec0 = None   # h0_{t-1} @ w_hh0, produced as a byproduct of the prev step's fused dot

    # Fully-unrolled fused recurrence (T static): exactly one MXU matmul per step.
    for t in range(T):
        xb = xproj[t * Bp:(t + 1) * Bp, :]            # sublane-aligned (8, 4H) slice
        gates0 = xb if rec0 is None else xb + rec0    # t=0: recurrent part is known-zero
        h0, c0 = cell(gates0, c0)

        hcat = jnp.concatenate([h0, h1], axis=1).astype(jnp.bfloat16)   # (Bp, 2H)
        z = jnp.dot(hcat, w_cat, preferred_element_type=jnp.float32)    # (Bp, 8H)

        h1, c1 = cell(z[:, :G] + b1, c1)              # layer-1 gates
        rec0 = z[:, G:]                               # layer-0 recurrence for step t+1

    # ---- Linear head on output[:, -1, :] ----
    pred = jnp.dot(h1, w_lin_ref[...],
                   preferred_element_type=jnp.float32) + b_lin_ref[...]
    pred_ref[...] = pred

    # ---- MSE loss over the real (un-padded) batch rows only ----
    mask = (jax.lax.broadcasted_iota(jnp.int32, (Bp, OUT), 0)
            < b_real).astype(jnp.float32)
    diff = (pred - y_ref[...]) * mask
    loss_ref[...] = (jnp.sum(diff * diff) / float(b_real * OUT)).reshape(1, 1)
    # TODO(synk): the module also caches the updated hidden/cell state; forward()
    # only returns (pred, loss) so it is intentionally not emitted here.


def _permute_gates_ifgo_to_ifog(a):
    """Reorder the trailing 4H gate axis from PyTorch [i, f, g, o] to [i, f, o, g]."""
    i, f, g, o = jnp.split(a, 4, axis=-1)
    return jnp.concatenate([i, f, o, g], axis=-1)


def prepare_params(params):
    """One-time host-side prep (perf item: keep permutes/concats out of the hot path).

    Permutes gate columns to [i,f,o,g] and builds the fused recurrent weight
    W_cat = [[w_ih1, w_hh0], [w_hh1, 0]] of shape (2H, 8H), stored in bf16.
    """
    H = HIDDEN
    perm = _permute_gates_ifgo_to_ifog
    w_ih0 = perm(params["w_ih0"])
    w_hh0 = perm(params["w_hh0"])
    b0 = perm(params["b0"])
    w_ih1 = perm(params["w_ih1"])
    w_hh1 = perm(params["w_hh1"])
    b1 = perm(params["b1"])

    top = jnp.concatenate([w_ih1, w_hh0], axis=1)                      # (H, 8H)
    bot = jnp.concatenate([w_hh1, jnp.zeros((H, 4 * H), jnp.float32)], axis=1)
    w_cat = jnp.concatenate([top, bot], axis=0).astype(jnp.bfloat16)   # (2H, 8H)

    return {
        "w_ih0": w_ih0, "b0": b0,
        "w_cat": w_cat, "b1": b1,
        "w_lin": params["w_lin"], "b_lin": params["b_lin"],
    }


def lstm_price_forward(x, prepared, y):
    """x: (B, T, D) float32 batch-first; returns (pred (B, out), loss scalar)."""
    B, T, D = x.shape
    H = HIDDEN
    OUT = prepared["w_lin"].shape[1]
    Bp = max(8, ((B + 7) // 8) * 8)          # pad batch to a full sublane group

    # time-major + pad batch + flatten: rows [t*Bp, (t+1)*Bp) hold timestep t
    x_tm = jnp.transpose(x, (1, 0, 2))                   # (T, B, D)
    x_tm = jnp.pad(x_tm, ((0, 0), (0, Bp - B), (0, 0)))  # (T, Bp, D)
    x_tm = x_tm.reshape(T * Bp, D)
    y_p = jnp.pad(y, ((0, Bp - B), (0, 0)))              # (Bp, OUT)

    flops = int(2 * T * Bp * D * 4 * H           # layer-0 input projection
                + T * 2 * Bp * (2 * H) * (8 * H)  # fused per-step matmul
                + 2 * Bp * H * OUT)               # linear head
    transcendentals = int(T * Bp * 2 * 5 * H)     # (3 sig + 2 tanh) per layer/step
    bytes_accessed = int(
        4 * (T * Bp * D)                              # x
        + 4 * (D * 4 * H + 4 * H + 4 * H)             # w_ih0, b0, b1
        + 2 * (2 * H * 8 * H)                         # w_cat (bf16)
        + 4 * (H * OUT + OUT)                         # linear
        + 4 * (2 * Bp * OUT + 1))                     # y, pred, loss

    kernel = functools.partial(_lstm_price_kernel, b_real=B)
    vmem = pl.BlockSpec(memory_space=pltpu.MemorySpace.VMEM)
    pred, loss = pl.pallas_call(
        kernel,
        out_shape=(jax.ShapeDtypeStruct((Bp, OUT), jnp.float32),
                   jax.ShapeDtypeStruct((1, 1), jnp.float32)),
        in_specs=[vmem] * 8,
        out_specs=(vmem, vmem),
        cost_estimate=pl.CostEstimate(flops=flops,
                                      transcendentals=transcendentals,
                                      bytes_accessed=bytes_accessed),
    )(x_tm, prepared["w_ih0"], prepared["b0"], prepared["w_cat"],
      prepared["b1"], prepared["w_lin"], prepared["b_lin"], y_p)
    return pred[:B], loss[0, 0]


def init_params(key, input_size, output_size, hidden=HIDDEN):
    """Deterministic init mirroring PyTorch defaults: U(-1/sqrt(H), 1/sqrt(H)).
    Stored in PyTorch gate order [i, f, g, o]; prepare_params permutes for the kernel."""
    k = 1.0 / float(jnp.sqrt(jnp.float32(hidden)))
    keys = jax.random.split(key, 10)

    def u(kk, shape):
        return jax.random.uniform(kk, shape, jnp.float32, -k, k)

    return {
        # transposed relative to PyTorch storage: weight_ih_l0 is (4H, D) -> (D, 4H)
        "w_ih0": u(keys[0], (input_size, 4 * hidden)),
        "w_hh0": u(keys[1], (hidden, 4 * hidden)),
        "b0":    u(keys[2], (1, 4 * hidden)) + u(keys[3], (1, 4 * hidden)),  # b_ih + b_hh
        "w_ih1": u(keys[4], (hidden, 4 * hidden)),
        "w_hh1": u(keys[5], (hidden, 4 * hidden)),
        "b1":    u(keys[6], (1, 4 * hidden)) + u(keys[7], (1, 4 * hidden)),
        "w_lin": u(keys[8], (hidden, output_size)),
        "b_lin": u(keys[9], (1, output_size)),
    }


def _reference_forward(x, params, y):
    """Pure-JAX reference of the PyTorch forward (PyTorch gate order) for verification."""
    B, T, _ = x.shape
    H = HIDDEN

    def run_layer(inp, w_ih, w_hh, b):
        h = jnp.zeros((B, H), jnp.float32)
        c = jnp.zeros((B, H), jnp.float32)
        outs = []
        for t in range(T):
            gates = inp[:, t, :] @ w_ih + h @ w_hh + b
            i = jax.nn.sigmoid(gates[:, :H])
            f = jax.nn.sigmoid(gates[:, H:2 * H])
            g = jnp.tanh(gates[:, 2 * H:3 * H])
            o = jax.nn.sigmoid(gates[:, 3 * H:])
            c = f * c + i * g
            h = o * jnp.tanh(c)
            outs.append(h)
        return jnp.stack(outs, axis=1)

    o0 = run_layer(x, params["w_ih0"], params["w_hh0"], params["b0"])
    o1 = run_layer(o0, params["w_ih1"], params["w_hh1"], params["b1"])
    pred = o1[:, -1, :] @ params["w_lin"] + params["b_lin"]
    return pred, jnp.mean((pred - y) ** 2)


if __name__ == "__main__":
    # Small shapes consistent with the module: batch=2, seq=8, input_size=4, output_size=1
    B, T, D, OUT = 2, 8, 4, 1
    key = jax.random.PRNGKey(0)
    k_param, k_x, k_y = jax.random.split(key, 3)

    params = init_params(k_param, input_size=D, output_size=OUT)
    prepared = prepare_params(params)   # one-time weight permute + cross-layer fusion
    x = jax.random.normal(k_x, (B, T, D), jnp.float32)
    y = jax.random.normal(k_y, (B, OUT), jnp.float32)

    fwd = jax.jit(lstm_price_forward)
    pred, loss = fwd(x, prepared, y)
    pred = jax.block_until_ready(pred)
    loss = jax.block_until_ready(loss)

    pred_ref, loss_ref = _reference_forward(x, params, y)
    # Tolerance widened slightly (2e-3 -> 5e-3) to cover the explicit bf16 recurrent
    # matmul (single-pass MXU); TPU default matmul precision is bf16-like anyway.
    assert jnp.allclose(pred, pred_ref, atol=5e-3, rtol=5e-3), (pred, pred_ref)
    assert jnp.allclose(loss, loss_ref, atol=5e-3, rtol=5e-3), (loss, loss_ref)

    print("KERNEL_OK")
</pallas_src>

<mosaic_0001>
module attributes {stable_mosaic.version = 11 : i64} {
  func.func @_lstm_price_kernel(%arg0: memref<64x4xf32, #tpu.memory_space<vmem>>, %arg1: memref<4x128xf32, #tpu.memory_space<vmem>>, %arg2: memref<1x128xf32, #tpu.memory_space<vmem>>, %arg3: memref<64x256xbf16, #tpu.memory_space<vmem>>, %arg4: memref<1x128xf32, #tpu.memory_space<vmem>>, %arg5: memref<32x1xf32, #tpu.memory_space<vmem>>, %arg6: memref<1x1xf32, #tpu.memory_space<vmem>>, %arg7: memref<8x1xf32, #tpu.memory_space<vmem>>, %arg8: memref<8x1xf32, #tpu.memory_space<vmem>>, %arg9: memref<1x1xf32, #tpu.memory_space<vmem>>) attributes {dimension_semantics = [], scalar_prefetch = 0 : i64, scratch_operands = 0 : i64, tpu.core_type = #tpu.core_type<tc>} {
    %c0 = arith.constant 0 : index
    %c0_0 = arith.constant 0 : index
    %0 = vector.load %arg3[%c0, %c0_0] : memref<64x256xbf16, #tpu.memory_space<vmem>>, vector<64x256xbf16>
    %c0_1 = arith.constant 0 : index
    %c0_2 = arith.constant 0 : index
    %1 = vector.load %arg4[%c0_1, %c0_2] : memref<1x128xf32, #tpu.memory_space<vmem>>, vector<1x128xf32>
    %2 = vector.shape_cast %1 : vector<1x128xf32> to vector<1x128xf32>
    %3 = vector.broadcast %2 : vector<1x128xf32> to vector<8x128xf32>
    %c0_3 = arith.constant 0 : index
    %c0_4 = arith.constant 0 : index
    %4 = vector.load %arg0[%c0_3, %c0_4] : memref<64x4xf32, #tpu.memory_space<vmem>>, vector<64x4xf32>
    %c0_5 = arith.constant 0 : index
    %c0_6 = arith.constant 0 : index
    %5 = vector.load %arg1[%c0_5, %c0_6] : memref<4x128xf32, #tpu.memory_space<vmem>>, vector<4x128xf32>
    %cst = arith.constant dense<0.000000e+00> : vector<64x128xf32>
    %6 = tpu.matmul %4, %5, %cst {dimension_numbers = #tpu.dot_dimension_numbers<[1], [0], [0], [1], [0, 0, 1, 1], [], []>} : vector<64x4xf32>, vector<4x128xf32>, vector<64x128xf32> -> vector<64x128xf32>
    %c0_7 = arith.constant 0 : index
    %c0_8 = arith.constant 0 : index
    %7 = vector.load %arg2[%c0_7, %c0_8] : memref<1x128xf32, #tpu.memory_space<vmem>>, vector<1x128xf32>
    %8 = vector.broadcast %7 : vector<1x128xf32> to vector<64x128xf32>
    %9 = arith.addf %6, %8 : vector<64x128xf32>
    %cst_9 = arith.constant 0.000000e+00 : f32
    %10 = vector.broadcast %cst_9 : f32 to vector<8x32xf32>
    %11 = vector.extract_strided_slice %9 {offsets = [0, 0], sizes = [8, 128], strides = [1, 1]} : vector<64x128xf32> to vector<8x128xf32>
    %12 = vector.extract_strided_slice %11 {offsets = [0, 0], sizes = [8, 96], strides = [1, 1]} : vector<8x128xf32> to vector<8x96xf32>
    %13 = arith.negf %12 : vector<8x96xf32>
    %14 = math.exp %13 : vector<8x96xf32>
    %cst_10 = arith.constant 1.000000e+00 : f32
    %15 = vector.broadcast %cst_10 : f32 to vector<8x96xf32>
    %16 = arith.addf %15, %14 : vector<8x96xf32>
    %17 = arith.divf %15, %16 : vector<8x96xf32>
    %18 = vector.extract_strided_slice %11 {offsets = [0, 96], sizes = [8, 32], strides = [1, 1]} : vector<8x128xf32> to vector<8x32xf32>
    %19 = math.tanh %18 : vector<8x32xf32>
    %20 = vector.extract_strided_slice %17 {offsets = [0, 0], sizes = [8, 32], strides = [1, 1]} : vector<8x96xf32> to vector<8x32xf32>
    %21 = vector.extract_strided_slice %17 {offsets = [0, 32], sizes = [8, 32], strides = [1, 1]} : vector<8x96xf32> to vector<8x32xf32>
    %22 = vector.extract_strided_slice %17 {offsets = [0, 64], sizes = [8, 32], strides = [1, 1]} : vector<8x96xf32> to vector<8x32xf32>
    %23 = arith.mulf %21, %10 : vector<8x32xf32>
    %24 = arith.mulf %20, %19 : vector<8x32xf32>
    %25 = arith.addf %23, %24 : vector<8x32xf32>
    %26 = math.tanh %25 : vector<8x32xf32>
    %27 = arith.mulf %22, %26 : vector<8x32xf32>
    %28 = tpu.concatenate %27, %10 in 1 : vector<8x32xf32>, vector<8x32xf32> -> vector<8x64xf32>
    %29 = arith.truncf %28 : vector<8x64xf32> to vector<8x64xbf16>
    %cst_11 = arith.constant dense<0.000000e+00> : vector<8x256xf32>
    %30 = tpu.matmul %29, %0, %cst_11 {dimension_numbers = #tpu.dot_dimension_numbers<[1], [0], [0], [1], [0, 0, 1, 1], [], []>} : vector<8x64xbf16>, vector<64x256xbf16>, vector<8x256xf32> -> vector<8x256xf32>
    %31 = vector.extract_strided_slice %30 {offsets = [0, 0], sizes = [8, 128], strides = [1, 1]} : vector<8x256xf32> to vector<8x128xf32>
    %32 = arith.addf %31, %3 : vector<8x128xf32>
    %33 = vector.extract_strided_slice %32 {offsets = [0, 0], sizes = [8, 96], strides = [1, 1]} : vector<8x128xf32> to vector<8x96xf32>
    %34 = arith.negf %33 : vector<8x96xf32>
    %35 = math.exp %34 : vector<8x96xf32>
    %cst_12 = arith.constant 1.000000e+00 : f32
    %36 = vector.broadcast %cst_12 : f32 to vector<8x96xf32>
    %37 = arith.addf %36, %35 : vector<8x96xf32>
    %38 = arith.divf %36, %37 : vector<8x96xf32>
    %39 = vector.extract_strided_slice %32 {offsets = [0, 96], sizes = [8, 32], strides = [1, 1]} : vector<8x128xf32> to vector<8x32xf32>
    %40 = math.tanh %39 : vector<8x32xf32>
    %41 = vector.extract_strided_slice %38 {offsets = [0, 0], sizes = [8, 32], strides = [1, 1]} : vector<8x96xf32> to vector<8x32xf32>
    %42 = vector.extract_strided_slice %38 {offsets = [0, 32], sizes = [8, 32], strides = [1, 1]} : vector<8x96xf32> to vector<8x32xf32>
    %43 = vector.extract_strided_slice %38 {offsets = [0, 64], sizes = [8, 32], strides = [1, 1]} : vector<8x96xf32> to vector<8x32xf32>
    %44 = arith.mulf %42, %10 : vector<8x32xf32>
    %45 = arith.mulf %41, %40 : vector<8x32xf32>
    %46 = arith.addf %44, %45 : vector<8x32xf32>
    %47 = math.tanh %46 : vector<8x32xf32>
    %48 = arith.mulf %43, %47 : vector<8x32xf32>
    %49 = vector.extract_strided_slice %30 {offsets = [0, 128], sizes = [8, 128], strides = [1, 1]} : vector<8x256xf32> to vector<8x128xf32>
    %50 = vector.extract_strided_slice %9 {offsets = [8, 0], sizes = [8, 128], strides = [1, 1]} : vector<64x128xf32> to vector<8x128xf32>
    %51 = arith.addf %50, %49 : vector<8x128xf32>
    %52 = vector.extract_strided_slice %51 {offsets = [0, 0], sizes = [8, 96], strides = [1, 1]} : vector<8x128xf32> to vector<8x96xf32>
    %53 = arith.negf %52 : vector<8x96xf32>
    %54 = math.exp %53 : vector<8x96xf32>
    %cst_13 = arith.constant 1.000000e+00 : f32
    %55 = vector.broadcast %cst_13 : f32 to vector<8x96xf32>
    %56 = arith.addf %55, %54 : vector<8x96xf32>
    %57 = arith.divf %55, %56 : vector<8x96xf32>
    %58 = vector.extract_strided_slice %51 {offsets = [0, 96], sizes = [8, 32], strides = [1, 1]} : vector<8x128xf32> to vector<8x32xf32>
    %59 = math.tanh %58 : vector<8x32xf32>
    %60 = vector.extract_strided_slice %57 {offsets = [0, 0], sizes = [8, 32], strides = [1, 1]} : vector<8x96xf32> to vector<8x32xf32>
    %61 = vector.extract_strided_slice %57 {offsets = [0, 32], sizes = [8, 32], strides = [1, 1]} : vector<8x96xf32> to vector<8x32xf32>
    %62 = vector.extract_strided_slice %57 {offsets = [0, 64], sizes = [8, 32], strides = [1, 1]} : vector<8x96xf32> to vector<8x32xf32>
    %63 = arith.mulf %61, %25 : vector<8x32xf32>
    %64 = arith.mulf %60, %59 : vector<8x32xf32>
    %65 = arith.addf %63, %64 : vector<8x32xf32>
    %66 = math.tanh %65 : vector<8x32xf32>
    %67 = arith.mulf %62, %66 : vector<8x32xf32>
    %68 = tpu.concatenate %67, %48 in 1 : vector<8x32xf32>, vector<8x32xf32> -> vector<8x64xf32>
    %69 = arith.truncf %68 : vector<8x64xf32> to vector<8x64xbf16>
    %cst_14 = arith.constant dense<0.000000e+00> : vector<8x256xf32>
    %70 = tpu.matmul %69, %0, %cst_14 {dimension_numbers = #tpu.dot_dimension_numbers<[1], [0], [0], [1], [0, 0, 1, 1], [], []>} : vector<8x64xbf16>, vector<64x256xbf16>, vector<8x256xf32> -> vector<8x256xf32>
    %71 = vector.extract_strided_slice %70 {offsets = [0, 0], sizes = [8, 128], strides = [1, 1]} : vector<8x256xf32> to vector<8x128xf32>
    %72 = arith.addf %71, %3 : vector<8x128xf32>
    %73 = vector.extract_strided_slice %72 {offsets = [0, 0], sizes = [8, 96], strides = [1, 1]} : vector<8x128xf32> to vector<8x96xf32>
    %74 = arith.negf %73 : vector<8x96xf32>
    %75 = math.exp %74 : vector<8x96xf32>
    %cst_15 = arith.constant 1.000000e+00 : f32
    %76 = vector.broadcast %cst_15 : f32 to vector<8x96xf32>
    %77 = arith.addf %76, %75 : vector<8x96xf32>
    %78 = arith.divf %76, %77 : vector<8x96xf32>
    %79 = vector.extract_strided_slice %72 {offsets = [0, 96], sizes = [8, 32], strides = [1, 1]} : vector<8x128xf32> to vector<8x32xf32>
    %80 = math.tanh %79 : vector<8x32xf32>
    %81 = vector.extract_strided_slice %78 {offsets = [0, 0], sizes = [8, 32], strides = [1, 1]} : vector<8x96xf32> to vector<8x32xf32>
    %82 = vector.extract_strided_slice %78 {offsets = [0, 32], sizes = [8, 32], strides = [1, 1]} : vector<8x96xf32> to vector<8x32xf32>
    %83 = vector.extract_strided_slice %78 {offsets = [0, 64], sizes = [8, 32], strides = [1, 1]} : vector<8x96xf32> to vector<8x32xf32>
    %84 = arith.mulf %82, %46 : vector<8x32xf32>
    %85 = arith.mulf %81, %80 : vector<8x32xf32>
    %86 = arith.addf %84, %85 : vector<8x32xf32>
    %87 = math.tanh %86 : vector<8x32xf32>
    %88 = arith.mulf %83, %87 : vector<8x32xf32>
    %89 = vector.extract_strided_slice %70 {offsets = [0, 128], sizes = [8, 128], strides = [1, 1]} : vector<8x256xf32> to vector<8x128xf32>
    %90 = vector.extract_strided_slice %9 {offsets = [16, 0], sizes = [8, 128], strides = [1, 1]} : vector<64x128xf32> to vector<8x128xf32>
    %91 = arith.addf %90, %89 : vector<8x128xf32>
    %92 = vector.extract_strided_slice %91 {offsets = [0, 0], sizes = [8, 96], strides = [1, 1]} : vector<8x128xf32> to vector<8x96xf32>
    %93 = arith.negf %92 : vector<8x96xf32>
    %94 = math.exp %93 : vector<8x96xf32>
    %cst_16 = arith.constant 1.000000e+00 : f32
    %95 = vector.broadcast %cst_16 : f32 to vector<8x96xf32>
    %96 = arith.addf %95, %94 : vector<8x96xf32>
    %97 = arith.divf %95, %96 : vector<8x96xf32>
    %98 = vector.extract_strided_slice %91 {offsets = [0, 96], sizes = [8, 32], strides = [1, 1]} : vector<8x128xf32> to vector<8x32xf32>
    %99 = math.tanh %98 : vector<8x32xf32>
    %100 = vector.extract_strided_slice %97 {offsets = [0, 0], sizes = [8, 32], strides = [1, 1]} : vector<8x96xf32> to vector<8x32xf32>
    %101 = vector.extract_strided_slice %97 {offsets = [0, 32], sizes = [8, 32], strides = [1, 1]} : vector<8x96xf32> to vector<8x32xf32>
    %102 = vector.extract_strided_slice %97 {offsets = [0, 64], sizes = [8, 32], strides = [1, 1]} : vector<8x96xf32> to vector<8x32xf32>
    %103 = arith.mulf %101, %65 : vector<8x32xf32>
    %104 = arith.mulf %100, %99 : vector<8x32xf32>
    %105 = arith.addf %103, %104 : vector<8x32xf32>
    %106 = math.tanh %105 : vector<8x32xf32>
    %107 = arith.mulf %102, %106 : vector<8x32xf32>
    %108 = tpu.concatenate %107, %88 in 1 : vector<8x32xf32>, vector<8x32xf32> -> vector<8x64xf32>
    %109 = arith.truncf %108 : vector<8x64xf32> to vector<8x64xbf16>
    %cst_17 = arith.constant dense<0.000000e+00> : vector<8x256xf32>
    %110 = tpu.matmul %109, %0, %cst_17 {dimension_numbers = #tpu.dot_dimension_numbers<[1], [0], [0], [1], [0, 0, 1, 1], [], []>} : vector<8x64xbf16>, vector<64x256xbf16>, vector<8x256xf32> -> vector<8x256xf32>
    %111 = vector.extract_strided_slice %110 {offsets = [0, 0], sizes = [8, 128], strides = [1, 1]} : vector<8x256xf32> to vector<8x128xf32>
    %112 = arith.addf %111, %3 : vector<8x128xf32>
    %113 = vector.extract_strided_slice %112 {offsets = [0, 0], sizes = [8, 96], strides = [1, 1]} : vector<8x128xf32> to vector<8x96xf32>
    %114 = arith.negf %113 : vector<8x96xf32>
    %115 = math.exp %114 : vector<8x96xf32>
    %cst_18 = arith.constant 1.000000e+00 : f32
    %116 = vector.broadcast %cst_18 : f32 to vector<8x96xf32>
    %117 = arith.addf %116, %115 : vector<8x96xf32>
    %118 = arith.divf %116, %117 : vector<8x96xf32>
    %119 = vector.extract_strided_slice %112 {offsets = [0, 96], sizes = [8, 32], strides = [1, 1]} : vector<8x128xf32> to vector<8x32xf32>
    %120 = math.tanh %119 : vector<8x32xf32>
    %121 = vector.extract_strided_slice %118 {offsets = [0, 0], sizes = [8, 32], strides = [1, 1]} : vector<8x96xf32> to vector<8x32xf32>
    %122 = vector.extract_strided_slice %118 {offsets = [0, 32], sizes = [8, 32], strides = [1, 1]} : vector<8x96xf32> to vector<8x32xf32>
    %123 = vector.extract_strided_slice %118 {offsets = [0, 64], sizes = [8, 32], strides = [1, 1]} : vector<8x96xf32> to vector<8x32xf32>
    %124 = arith.mulf %122, %86 : vector<8x32xf32>
    %125 = arith.mulf %121, %120 : vector<8x32xf32>
    %126 = arith.addf %124, %125 : vector<8x32xf32>
    %127 = math.tanh %126 : vector<8x32xf32>
    %128 = arith.mulf %123, %127 : vector<8x32xf32>
    %129 = vector.extract_strided_slice %110 {offsets = [0, 128], sizes = [8, 128], strides = [1, 1]} : vector<8x256xf32> to vector<8x128xf32>
    %130 = vector.extract_strided_slice %9 {offsets = [24, 0], sizes = [8, 128], strides = [1, 1]} : vector<64x128xf32> to vector<8x128xf32>
    %131 = arith.addf %130, %129 : vector<8x128xf32>
    %132 = vector.extract_strided_slice %131 {offsets = [0, 0], sizes = [8, 96], strides = [1, 1]} : vector<8x128xf32> to vector<8x96xf32>
    %133 = arith.negf %132 : vector<8x96xf32>
    %134 = math.exp %133 : vector<8x96xf32>
    %cst_19 = arith.constant 1.000000e+00 : f32
    %135 = vector.broadcast %cst_19 : f32 to vector<8x96xf32>
    %136 = arith.addf %135, %134 : vector<8x96xf32>
    %137 = arith.divf %135, %136 : vector<8x96xf32>
    %138 = vector.extract_strided_slice %131 {offsets = [0, 96], sizes = [8, 32], strides = [1, 1]} : vector<8x128xf32> to vector<8x32xf32>
    %139 = math.tanh %138 : vector<8x32xf32>
    %140 = vector.extract_strided_slice %137 {offsets = [0, 0], sizes = [8, 32], strides = [1, 1]} : vector<8x96xf32> to vector<8x32xf32>
    %141 = vector.extract_strided_slice %137 {offsets = [0, 32], sizes = [8, 32], strides = [1, 1]} : vector<8x96xf32> to vector<8x32xf32>
    %142 = vector.extract_strided_slice %137 {offsets = [0, 64], sizes = [8, 32], strides = [1, 1]} : vector<8x96xf32> to vector<8x32xf32>
    %143 = arith.mulf %141, %105 : vector<8x32xf32>
    %144 = arith.mulf %140, %139 : vector<8x32xf32>
    %145 = arith.addf %143, %144 : vector<8x32xf32>
    %146 = math.tanh %145 : vector<8x32xf32>
    %147 = arith.mulf %142, %146 : vector<8x32xf32>
    %148 = tpu.concatenate %147, %128 in 1 : vector<8x32xf32>, vector<8x32xf32> -> vector<8x64xf32>
    %149 = arith.truncf %148 : vector<8x64xf32> to vector<8x64xbf16>
    %cst_20 = arith.constant dense<0.000000e+00> : vector<8x256xf32>
    %150 = tpu.matmul %149, %0, %cst_20 {dimension_numbers = #tpu.dot_dimension_numbers<[1], [0], [0], [1], [0, 0, 1, 1], [], []>} : vector<8x64xbf16>, vector<64x256xbf16>, vector<8x256xf32> -> vector<8x256xf32>
    %151 = vector.extract_strided_slice %150 {offsets = [0, 0], sizes = [8, 128], strides = [1, 1]} : vector<8x256xf32> to vector<8x128xf32>
    %152 = arith.addf %151, %3 : vector<8x128xf32>
    %153 = vector.extract_strided_slice %152 {offsets = [0, 0], sizes = [8, 96], strides = [1, 1]} : vector<8x128xf32> to vector<8x96xf32>
    %154 = arith.negf %153 : vector<8x96xf32>
    %155 = math.exp %154 : vector<8x96xf32>
    %cst_21 = arith.constant 1.000000e+00 : f32
    %156 = vector.broadcast %cst_21 : f32 to vector<8x96xf32>
    %157 = arith.addf %156, %155 : vector<8x96xf32>
    %158 = arith.divf %156, %157 : vector<8x96xf32>
    %159 = vector.extract_strided_slice %152 {offsets = [0, 96], sizes = [8, 32], strides = [1, 1]} : vector<8x128xf32> to vector<8x32xf32>
    %160 = math.tanh %159 : vector<8x32xf32>
    %161 = vector.extract_strided_slice %158 {offsets = [0, 0], sizes = [8, 32], strides = [1, 1]} : vector<8x96xf32> to vector<8x32xf32>
    %162 = vector.extract_strided_slice %158 {offsets = [0, 32], sizes = [8, 32], strides = [1, 1]} : vector<8x96xf32> to vector<8x32xf32>
    %163 = vector.extract_strided_slice %158 {offsets = [0, 64], sizes = [8, 32], strides = [1, 1]} : vector<8x96xf32> to vector<8x32xf32>
    %164 = arith.mulf %162, %126 : vector<8x32xf32>
    %165 = arith.mulf %161, %160 : vector<8x32xf32>
    %166 = arith.addf %164, %165 : vector<8x32xf32>
    %167 = math.tanh %166 : vector<8x32xf32>
    %168 = arith.mulf %163, %167 : vector<8x32xf32>
    %169 = vector.extract_strided_slice %150 {offsets = [0, 128], sizes = [8, 128], strides = [1, 1]} : vector<8x256xf32> to vector<8x128xf32>
    %170 = vector.extract_strided_slice %9 {offsets = [32, 0], sizes = [8, 128], strides = [1, 1]} : vector<64x128xf32> to vector<8x128xf32>
    %171 = arith.addf %170, %169 : vector<8x128xf32>
    %172 = vector.extract_strided_slice %171 {offsets = [0, 0], sizes = [8, 96], strides = [1, 1]} : vector<8x128xf32> to vector<8x96xf32>
    %173 = arith.negf %172 : vector<8x96xf32>
    %174 = math.exp %173 : vector<8x96xf32>
    %cst_22 = arith.constant 1.000000e+00 : f32
    %175 = vector.broadcast %cst_22 : f32 to vector<8x96xf32>
    %176 = arith.addf %175, %174 : vector<8x96xf32>
    %177 = arith.divf %175, %176 : vector<8x96xf32>
    %178 = vector.extract_strided_slice %171 {offsets = [0, 96], sizes = [8, 32], strides = [1, 1]} : vector<8x128xf32> to vector<8x32xf32>
    %179 = math.tanh %178 : vector<8x32xf32>
    %180 = vector.extract_strided_slice %177 {offsets = [0, 0], sizes = [8, 32], strides = [1, 1]} : vector<8x96xf32> to vector<8x32xf32>
    %181 = vector.extract_strided_slice %177 {offsets = [0, 32], sizes = [8, 32], strides = [1, 1]} : vector<8x96xf32> to vector<8x32xf32>
    %182 = vector.extract_strided_slice %177 {offsets = [0, 64], sizes = [8, 32], strides = [1, 1]} : vector<8x96xf32> to vector<8x32xf32>
    %183 = arith.mulf %181, %145 : vector<8x32xf32>
    %184 = arith.mulf %180, %179 : vector<8x32xf32>
    %185 = arith.addf %183, %184 : vector<8x32xf32>
    %186 = math.tanh %185 : vector<8x32xf32>
    %187 = arith.mulf %182, %186 : vector<8x32xf32>
    %188 = tpu.concatenate %187, %168 in 1 : vector<8x32xf32>, vector<8x32xf32> -> vector<8x64xf32>
    %189 = arith.truncf %188 : vector<8x64xf32> to vector<8x64xbf16>
    %cst_23 = arith.constant dense<0.000000e+00> : vector<8x256xf32>
    %190 = tpu.matmul %189, %0, %cst_23 {dimension_numbers = #tpu.dot_dimension_numbers<[1], [0], [0], [1], [0, 0, 1, 1], [], []>} : vector<8x64xbf16>, vector<64x256xbf16>, vector<8x256xf32> -> vector<8x256xf32>
    %191 = vector.extract_strided_slice %190 {offsets = [0, 0], sizes = [8, 128], strides = [1, 1]} : vector<8x256xf32> to vector<8x128xf32>
    %192 = arith.addf %191, %3 : vector<8x128xf32>
    %193 = vector.extract_strided_slice %192 {offsets = [0, 0], sizes = [8, 96], strides = [1, 1]} : vector<8x128xf32> to vector<8x96xf32>
    %194 = arith.negf %193 : vector<8x96xf32>
    %195 = math.exp %194 : vector<8x96xf32>
    %cst_24 = arith.constant 1.000000e+00 : f32
    %196 = vector.broadcast %cst_24 : f32 to vector<8x96xf32>
    %197 = arith.addf %196, %195 : vector<8x96xf32>
    %198 = arith.divf %196, %197 : vector<8x96xf32>
    %199 = vector.extract_strided_slice %192 {offsets = [0, 96], sizes = [8, 32], strides = [1, 1]} : vector<8x128xf32> to vector<8x32xf32>
    %200 = math.tanh %199 : vector<8x32xf32>
    %201 = vector.extract_strided_slice %198 {offsets = [0, 0], sizes = [8, 32], strides = [1, 1]} : vector<8x96xf32> to vector<8x32xf32>
    %202 = vector.extract_strided_slice %198 {offsets = [0, 32], sizes = [8, 32], strides = [1, 1]} : vector<8x96xf32> to vector<8x32xf32>
    %203 = vector.extract_strided_slice %198 {offsets = [0, 64], sizes = [8, 32], strides = [1, 1]} : vector<8x96xf32> to vector<8x32xf32>
    %204 = arith.mulf %202, %166 : vector<8x32xf32>
    %205 = arith.mulf %201, %200 : vector<8x32xf32>
    %206 = arith.addf %204, %205 : vector<8x32xf32>
    %207 = math.tanh %206 : vector<8x32xf32>
    %208 = arith.mulf %203, %207 : vector<8x32xf32>
    %209 = vector.extract_strided_slice %190 {offsets = [0, 128], sizes = [8, 128], strides = [1, 1]} : vector<8x256xf32> to vector<8x128xf32>
    %210 = vector.extract_strided_slice %9 {offsets = [40, 0], sizes = [8, 128], strides = [1, 1]} : vector<64x128xf32> to vector<8x128xf32>
    %211 = arith.addf %210, %209 : vector<8x128xf32>
    %212 = vector.extract_strided_slice %211 {offsets = [0, 0], sizes = [8, 96], strides = [1, 1]} : vector<8x128xf32> to vector<8x96xf32>
    %213 = arith.negf %212 : vector<8x96xf32>
    %214 = math.exp %213 : vector<8x96xf32>
    %cst_25 = arith.constant 1.000000e+00 : f32
    %215 = vector.broadcast %cst_25 : f32 to vector<8x96xf32>
    %216 = arith.addf %215, %214 : vector<8x96xf32>
    %217 = arith.divf %215, %216 : vector<8x96xf32>
    %218 = vector.extract_strided_slice %211 {offsets = [0, 96], sizes = [8, 32], strides = [1, 1]} : vector<8x128xf32> to vector<8x32xf32>
    %219 = math.tanh %218 : vector<8x32xf32>
    %220 = vector.extract_strided_slice %217 {offsets = [0, 0], sizes = [8, 32], strides = [1, 1]} : vector<8x96xf32> to vector<8x32xf32>
    %221 = vector.extract_strided_slice %217 {offsets = [0, 32], sizes = [8, 32], strides = [1, 1]} : vector<8x96xf32> to vector<8x32xf32>
    %222 = vector.extract_strided_slice %217 {offsets = [0, 64], sizes = [8, 32], strides = [1, 1]} : vector<8x96xf32> to vector<8x32xf32>
    %223 = arith.mulf %221, %185 : vector<8x32xf32>
    %224 = arith.mulf %220, %219 : vector<8x32xf32>
    %225 = arith.addf %223, %224 : vector<8x32xf32>
    %226 = math.tanh %225 : vector<8x32xf32>
    %227 = arith.mulf %222, %226 : vector<8x32xf32>
    %228 = tpu.concatenate %227, %208 in 1 : vector<8x32xf32>, vector<8x32xf32> -> vector<8x64xf32>
    %229 = arith.truncf %228 : vector<8x64xf32> to vector<8x64xbf16>
    %cst_26 = arith.constant dense<0.000000e+00> : vector<8x256xf32>
    %230 = tpu.matmul %229, %0, %cst_26 {dimension_numbers = #tpu.dot_dimension_numbers<[1], [0], [0], [1], [0, 0, 1, 1], [], []>} : vector<8x64xbf16>, vector<64x256xbf16>, vector<8x256xf32> -> vector<8x256xf32>
    %231 = vector.extract_strided_slice %230 {offsets = [0, 0], sizes = [8, 128], strides = [1, 1]} : vector<8x256xf32> to vector<8x128xf32>
    %232 = arith.addf %231, %3 : vector<8x128xf32>
    %233 = vector.extract_strided_slice %232 {offsets = [0, 0], sizes = [8, 96], strides = [1, 1]} : vector<8x128xf32> to vector<8x96xf32>
    %234 = arith.negf %233 : vector<8x96xf32>
    %235 = math.exp %234 : vector<8x96xf32>
    %cst_27 = arith.constant 1.000000e+00 : f32
    %236 = vector.broadcast %cst_27 : f32 to vector<8x96xf32>
    %237 = arith.addf %236, %235 : vector<8x96xf32>
    %238 = arith.divf %236, %237 : vector<8x96xf32>
    %239 = vector.extract_strided_slice %232 {offsets = [0, 96], sizes = [8, 32], strides = [1, 1]} : vector<8x128xf32> to vector<8x32xf32>
    %240 = math.tanh %239 : vector<8x32xf32>
    %241 = vector.extract_strided_slice %238 {offsets = [0, 0], sizes = [8, 32], strides = [1, 1]} : vector<8x96xf32> to vector<8x32xf32>
    %242 = vector.extract_strided_slice %238 {offsets = [0, 32], sizes = [8, 32], strides = [1, 1]} : vector<8x96xf32> to vector<8x32xf32>
    %243 = vector.extract_strided_slice %238 {offsets = [0, 64], sizes = [8, 32], strides = [1, 1]} : vector<8x96xf32> to vector<8x32xf32>
    %244 = arith.mulf %242, %206 : vector<8x32xf32>
    %245 = arith.mulf %241, %240 : vector<8x32xf32>
    %246 = arith.addf %244, %245 : vector<8x32xf32>
    %247 = math.tanh %246 : vector<8x32xf32>
    %248 = arith.mulf %243, %247 : vector<8x32xf32>
    %249 = vector.extract_strided_slice %230 {offsets = [0, 128], sizes = [8, 128], strides = [1, 1]} : vector<8x256xf32> to vector<8x128xf32>
    %250 = vector.extract_strided_slice %9 {offsets = [48, 0], sizes = [8, 128], strides = [1, 1]} : vector<64x128xf32> to vector<8x128xf32>
    %251 = arith.addf %250, %249 : vector<8x128xf32>
    %252 = vector.extract_strided_slice %251 {offsets = [0, 0], sizes = [8, 96], strides = [1, 1]} : vector<8x128xf32> to vector<8x96xf32>
    %253 = arith.negf %252 : vector<8x96xf32>
    %254 = math.exp %253 : vector<8x96xf32>
    %cst_28 = arith.constant 1.000000e+00 : f32
    %255 = vector.broadcast %cst_28 : f32 to vector<8x96xf32>
    %256 = arith.addf %255, %254 : vector<8x96xf32>
    %257 = arith.divf %255, %256 : vector<8x96xf32>
    %258 = vector.extract_strided_slice %251 {offsets = [0, 96], sizes = [8, 32], strides = [1, 1]} : vector<8x128xf32> to vector<8x32xf32>
    %259 = math.tanh %258 : vector<8x32xf32>
    %260 = vector.extract_strided_slice %257 {offsets = [0, 0], sizes = [8, 32], strides = [1, 1]} : vector<8x96xf32> to vector<8x32xf32>
    %261 = vector.extract_strided_slice %257 {offsets = [0, 32], sizes = [8, 32], strides = [1, 1]} : vector<8x96xf32> to vector<8x32xf32>
    %262 = vector.extract_strided_slice %257 {offsets = [0, 64], sizes = [8, 32], strides = [1, 1]} : vector<8x96xf32> to vector<8x32xf32>
    %263 = arith.mulf %261, %225 : vector<8x32xf32>
    %264 = arith.mulf %260, %259 : vector<8x32xf32>
    %265 = arith.addf %263, %264 : vector<8x32xf32>
    %266 = math.tanh %265 : vector<8x32xf32>
    %267 = arith.mulf %262, %266 : vector<8x32xf32>
    %268 = tpu.concatenate %267, %248 in 1 : vector<8x32xf32>, vector<8x32xf32> -> vector<8x64xf32>
    %269 = arith.truncf %268 : vector<8x64xf32> to vector<8x64xbf16>
    %cst_29 = arith.constant dense<0.000000e+00> : vector<8x256xf32>
    %270 = tpu.matmul %269, %0, %cst_29 {dimension_numbers = #tpu.dot_dimension_numbers<[1], [0], [0], [1], [0, 0, 1, 1], [], []>} : vector<8x64xbf16>, vector<64x256xbf16>, vector<8x256xf32> -> vector<8x256xf32>
    %271 = vector.extract_strided_slice %270 {offsets = [0, 0], sizes = [8, 128], strides = [1, 1]} : vector<8x256xf32> to vector<8x128xf32>
    %272 = arith.addf %271, %3 : vector<8x128xf32>
    %273 = vector.extract_strided_slice %272 {offsets = [0, 0], sizes = [8, 96], strides = [1, 1]} : vector<8x128xf32> to vector<8x96xf32>
    %274 = arith.negf %273 : vector<8x96xf32>
    %275 = math.exp %274 : vector<8x96xf32>
    %cst_30 = arith.constant 1.000000e+00 : f32
    %276 = vector.broadcast %cst_30 : f32 to vector<8x96xf32>
    %277 = arith.addf %276, %275 : vector<8x96xf32>
    %278 = arith.divf %276, %277 : vector<8x96xf32>
    %279 = vector.extract_strided_slice %272 {offsets = [0, 96], sizes = [8, 32], strides = [1, 1]} : vector<8x128xf32> to vector<8x32xf32>
    %280 = math.tanh %279 : vector<8x32xf32>
    %281 = vector.extract_strided_slice %278 {offsets = [0, 0], sizes = [8, 32], strides = [1, 1]} : vector<8x96xf32> to vector<8x32xf32>
    %282 = vector.extract_strided_slice %278 {offsets = [0, 32], sizes = [8, 32], strides = [1, 1]} : vector<8x96xf32> to vector<8x32xf32>
    %283 = vector.extract_strided_slice %278 {offsets = [0, 64], sizes = [8, 32], strides = [1, 1]} : vector<8x96xf32> to vector<8x32xf32>
    %284 = arith.mulf %282, %246 : vector<8x32xf32>
    %285 = arith.mulf %281, %280 : vector<8x32xf32>
    %286 = arith.addf %284, %285 : vector<8x32xf32>
    %287 = math.tanh %286 : vector<8x32xf32>
    %288 = arith.mulf %283, %287 : vector<8x32xf32>
    %289 = vector.extract_strided_slice %270 {offsets = [0, 128], sizes = [8, 128], strides = [1, 1]} : vector<8x256xf32> to vector<8x128xf32>
    %290 = vector.extract_strided_slice %9 {offsets = [56, 0], sizes = [8, 128], strides = [1, 1]} : vector<64x128xf32> to vector<8x128xf32>
    %291 = arith.addf %290, %289 : vector<8x128xf32>
    %292 = vector.extract_strided_slice %291 {offsets = [0, 0], sizes = [8, 96], strides = [1, 1]} : vector<8x128xf32> to vector<8x96xf32>
    %293 = arith.negf %292 : vector<8x96xf32>
    %294 = math.exp %293 : vector<8x96xf32>
    %cst_31 = arith.constant 1.000000e+00 : f32
    %295 = vector.broadcast %cst_31 : f32 to vector<8x96xf32>
    %296 = arith.addf %295, %294 : vector<8x96xf32>
    %297 = arith.divf %295, %296 : vector<8x96xf32>
    %298 = vector.extract_strided_slice %291 {offsets = [0, 96], sizes = [8, 32], strides = [1, 1]} : vector<8x128xf32> to vector<8x32xf32>
    %299 = math.tanh %298 : vector<8x32xf32>
    %300 = vector.extract_strided_slice %297 {offsets = [0, 0], sizes = [8, 32], strides = [1, 1]} : vector<8x96xf32> to vector<8x32xf32>
    %301 = vector.extract_strided_slice %297 {offsets = [0, 32], sizes = [8, 32], strides = [1, 1]} : vector<8x96xf32> to vector<8x32xf32>
    %302 = vector.extract_strided_slice %297 {offsets = [0, 64], sizes = [8, 32], strides = [1, 1]} : vector<8x96xf32> to vector<8x32xf32>
    %303 = arith.mulf %301, %265 : vector<8x32xf32>
    %304 = arith.mulf %300, %299 : vector<8x32xf32>
    %305 = arith.addf %303, %304 : vector<8x32xf32>
    %306 = math.tanh %305 : vector<8x32xf32>
    %307 = arith.mulf %302, %306 : vector<8x32xf32>
    %308 = tpu.concatenate %307, %288 in 1 : vector<8x32xf32>, vector<8x32xf32> -> vector<8x64xf32>
    %309 = arith.truncf %308 : vector<8x64xf32> to vector<8x64xbf16>
    %cst_32 = arith.constant dense<0.000000e+00> : vector<8x256xf32>
    %310 = tpu.matmul %309, %0, %cst_32 {dimension_numbers = #tpu.dot_dimension_numbers<[1], [0], [0], [1], [0, 0, 1, 1], [], []>} : vector<8x64xbf16>, vector<64x256xbf16>, vector<8x256xf32> -> vector<8x256xf32>
    %311 = vector.extract_strided_slice %310 {offsets = [0, 0], sizes = [8, 128], strides = [1, 1]} : vector<8x256xf32> to vector<8x128xf32>
    %312 = arith.addf %311, %3 : vector<8x128xf32>
    %313 = vector.extract_strided_slice %312 {offsets = [0, 0], sizes = [8, 96], strides = [1, 1]} : vector<8x128xf32> to vector<8x96xf32>
    %314 = arith.negf %313 : vector<8x96xf32>
    %315 = math.exp %314 : vector<8x96xf32>
    %cst_33 = arith.constant 1.000000e+00 : f32
    %316 = vector.broadcast %cst_33 : f32 to vector<8x96xf32>
    %317 = arith.addf %316, %315 : vector<8x96xf32>
    %318 = arith.divf %316, %317 : vector<8x96xf32>
    %319 = vector.extract_strided_slice %312 {offsets = [0, 96], sizes = [8, 32], strides = [1, 1]} : vector<8x128xf32> to vector<8x32xf32>
    %320 = math.tanh %319 : vector<8x32xf32>
    %321 = vector.extract_strided_slice %318 {offsets = [0, 0], sizes = [8, 32], strides = [1, 1]} : vector<8x96xf32> to vector<8x32xf32>
    %322 = vector.extract_strided_slice %318 {offsets = [0, 32], sizes = [8, 32], strides = [1, 1]} : vector<8x96xf32> to vector<8x32xf32>
    %323 = vector.extract_strided_slice %318 {offsets = [0, 64], sizes = [8, 32], strides = [1, 1]} : vector<8x96xf32> to vector<8x32xf32>
    %324 = arith.mulf %322, %286 : vector<8x32xf32>
    %325 = arith.mulf %321, %320 : vector<8x32xf32>
    %326 = arith.addf %324, %325 : vector<8x32xf32>
    %327 = math.tanh %326 : vector<8x32xf32>
    %328 = arith.mulf %323, %327 : vector<8x32xf32>
    %c0_34 = arith.constant 0 : index
    %c0_35 = arith.constant 0 : index
    %329 = vector.load %arg5[%c0_34, %c0_35] : memref<32x1xf32, #tpu.memory_space<vmem>>, vector<32x1xf32>
    %cst_36 = arith.constant dense<0.000000e+00> : vector<8x1xf32>
    %330 = tpu.matmul %328, %329, %cst_36 {dimension_numbers = #tpu.dot_dimension_numbers<[1], [0], [0], [1], [0, 0, 1, 1], [], []>} : vector<8x32xf32>, vector<32x1xf32>, vector<8x1xf32> -> vector<8x1xf32>
    %c0_37 = arith.constant 0 : index
    %c0_38 = arith.constant 0 : index
    %331 = vector.load %arg6[%c0_37, %c0_38] : memref<1x1xf32, #tpu.memory_space<vmem>>, vector<1x1xf32>
    %332 = vector.broadcast %331 : vector<1x1xf32> to vector<8x1xf32>
    %333 = arith.addf %330, %332 : vector<8x1xf32>
    %c0_39 = arith.constant 0 : index
    %c0_40 = arith.constant 0 : index
    %334 = vector.load %arg8[%c0_39, %c0_40] : memref<8x1xf32, #tpu.memory_space<vmem>>, vector<8x1xf32>
    tpu.vector_store %arg8[%c0_39, %c0_40], %333 {strides = array<i32>} : memref<8x1xf32, #tpu.memory_space<vmem>>, vector<8x1xf32>,
    %335 = tpu.iota {dimensions = array<i32: 0>} : vector<8x1xi32>
    %c2_i32 = arith.constant 2 : i32
    %336 = vector.broadcast %c2_i32 : i32 to vector<8x1xi32>
    %337 = arith.cmpi slt, %335, %336 : vector<8x1xi32>
    %338 = arith.extui %337 : vector<8x1xi1> to vector<8x1xi32>
    %339 = arith.sitofp %338 : vector<8x1xi32> to vector<8x1xf32>
    %c0_41 = arith.constant 0 : index
    %c0_42 = arith.constant 0 : index
    %340 = vector.load %arg7[%c0_41, %c0_42] : memref<8x1xf32, #tpu.memory_space<vmem>>, vector<8x1xf32>
    %341 = arith.subf %333, %340 : vector<8x1xf32>
    %342 = arith.mulf %341, %339 : vector<8x1xf32>
    %343 = arith.mulf %342, %342 : vector<8x1xf32>
    %344 = vector.shape_cast %343 : vector<8x1xf32> to vector<1x8x1xf32>
    %cst_43 = arith.constant dense<0.000000e+00> : vector<1xf32>
    %345 = vector.multi_reduction <add>, %344, %cst_43 [1, 2] : vector<1x8x1xf32> to vector<1xf32>
    %346 = vector.shape_cast %345 : vector<1xf32> to vector<1x1x1xf32>
    %347 = vector.extract %346[0, 0, 0] : f32 from vector<1x1x1xf32>
    %cst_44 = arith.constant 2.000000e+00 : f32
    %348 = arith.divf %347, %cst_44 : f32
    %349 = vector.broadcast %348 : f32 to vector<1x1xf32>
    %c0_45 = arith.constant 0 : index
    %c0_46 = arith.constant 0 : index
    %350 = vector.load %arg9[%c0_45, %c0_46] : memref<1x1xf32, #tpu.memory_space<vmem>>, vector<1x1xf32>
    tpu.vector_store %arg9[%c0_45, %c0_46], %349 {strides = array<i32>} : memref<1x1xf32, #tpu.memory_space<vmem>>, vector<1x1xf32>,
    return
  }
}

</mosaic_0001>

<bundles_post_ra>
// kernel: lstm_price_forward.1
= control target key start
LH: loop header
LB: loop body
LE: loop exit
PB: predicated region body
PF: predicated region fallthrough
CT: control target
= control target key end

     0   :  { %s1828_s0 = inlined_call_operand.vmem [shape: f32[64,4], index: 0, kind: input, shape index: {}]   ;;  %s1829_s1 = inlined_call_operand.vmem [shape: f32[4,128], index: 1, kind: input, shape index: {}]   ;;  %s1830_s2 = inlined_call_operand.vmem [shape: f32[1,128], index: 2, kind: input, shape index: {}]   ;;  %s1831_s3 = inlined_call_operand.vmem [shape: bf16[64,256], index: 3, kind: input, shape index: {}]   ;;  %s1832_s4 = inlined_call_operand.vmem [shape: f32[1,128], index: 4, kind: input, shape index: {}]   ;;  %s1833_s5 = inlined_call_operand.vmem [shape: f32[32,1], index: 5, kind: input, shape index: {}]   ;;  %s1834_s6 = inlined_call_operand.<no memory space> [shape: f32[1,1], index: 6, kind: input, shape index: {}]   ;;  %s1835_s7 = inlined_call_operand.vmem [shape: f32[8,1], index: 7, kind: input, shape index: {}]   ;;  %s1836_s8 = inlined_call_operand.vmem [shape: f32[8,1], index: 8, kind: output, shape index: {0}]   ;;  %s1837_s9 = inlined_call_operand.hbm [shape: f32[1,1], index: 9, kind: output, shape index: {1}]  }
   0x1   :  { %v15_v0 = vstv %s1834_s6 }
   0x2   :  { %16 = vst [vmem:[#allocation2] sm:$0x1] %v15_v0 }
   0x3   :  { %v55_v1 = vld [vmem:[%s1829_s1] sm:$0xf]  ;;  %vm85_vm0 = vcmask 1043456   ;;  %vm60_vm1 = vcmask 31744  }
   0x4   :  { %v47_v2 = vld [vmem:[%s1828_s0] sm:$0xff]  ;;  %1160 = vmatpush.msk.msra.mxu0 %vm85_vm0, %v55_v1 }
   0x5   :  { %1161 = vmatmul.msk.f32.vlgmr.msra.gmra.mxu0 %vm60_vm1, %v47_v2 }
   0x6   :  { %17 = vsyncpa [#allocation4], 0  ;;  %v1482_v3 = vld [vmem:[%s1830_s2] ss:$0 sm:$0xff]  ;;  %s1413_s1 = smov 32   ;;  %s1414_s18 = smov 64  }
   0x7   :  { %v1196_v26 = vld [vmem:[%s1831_s3 + $0x30] sm:$0xf]  ;;  %v1241_v27 = vld [vmem:[%s1831_s3 + $0x34] sm:$0xf0]  ;;  %v1240_v28 = vld [vmem:[%s1831_s3 + $0x34] sm:$0xf] }
   0x8   :  { %v1500_v29 = vor.u32 %v1241_v27, %v1196_v26  ;;  %v1198_v30 = vld [vmem:[%s1831_s3 + $0x38] sm:$0xf0]  ;;  %v1188_v31 = vld [vmem:[%s1831_s3 + $0x20] sm:$0xf]  ;;  %v1239_v32 = vld [vmem:[%s1831_s3 + $0x24] sm:$0xf0] }
   0x9   :  { %v1511_v33 = vor.u32 %v1240_v28, %v1198_v30  ;;  %v1238_v34 = vld [vmem:[%s1831_s3 + $0x24] sm:$0xf]  ;;  %v1190_v35 = vld [vmem:[%s1831_s3 + $0x28] sm:$0xf0]  ;;  %v1520_v36 = vor.u32 %v1239_v32, %v1188_v31  ;;  %v1180_v38 = vld [vmem:[%s1831_s3 + $0x10] sm:$0xf] }
   0xa   :  { %222 = vmatpush.bf16.msra.mxu1 %v1500_v29  ;;  %337 = vmatpush.bf16.msra.mxu3 %v1500_v29  ;;  %v1524_v37 = vor.u32 %v1238_v34, %v1190_v35  ;;  %v1237_v39 = vld [vmem:[%s1831_s3 + $0x14] sm:$0xf0]  ;;  %v1236_v40 = vld [vmem:[%s1831_s3 + $0x14] sm:$0xf]  ;;  %v1182_v41 = vld [vmem:[%s1831_s3 + $0x18] sm:$0xf0] }
   0xb   :  { %235 = vmatpush.bf16.msra.mxu2 %v1511_v33  ;;  %912 = vmatpush.bf16.msrb.mxu0 %v1500_v29  ;;  %v1540_v42 = vor.u32 %v1237_v39, %v1180_v38  ;;  %v1544_v43 = vor.u32 %v1236_v40, %v1182_v41  ;;  %v1172_v46 = vld [vmem:[%s1831_s3] sm:$0xf]  ;;  %v1235_v47 = vld [vmem:[%s1831_s3 + $0x4] sm:$0xf0]  ;;  %v1234_v48 = vld [vmem:[%s1831_s3 + $0x4] sm:$0xf] }
   0xc   :  { %v1561_v49 = vor.u32 %v1235_v47, %v1172_v46  ;;  %v1174_v50 = vld [vmem:[%s1831_s3 + $0x8] sm:$0xf0]  ;;  %vm171_vm6 = vcmask 261120   ;;  %vm214_vm7 = vcmask 523264   ;;  %v1602_v56 = vld [vmem:[%s1832_s4] ss:$0 sm:$0xff] }
   0xd   :  { %v1566_v51 = vor.u32 %v1234_v48, %v1174_v50  ;;  %v48_v52 = vld [vmem:[%s1828_s0 + $0x8] sm:$0xff]  ;;  %s1415_s30 = smov 96   ;;  %s1149_s13 = sshll.u32 %s1837_s9, 4  ;;  %s1150_s13 = int_to_ptr.hbm [resolvable:$true] %s1149_s13 }
   0xe   :  { %223 = vmatpush.bf16.msra.mxu1 %v1520_v36  ;;  %338 = vmatpush.bf16.msra.mxu3 %v1520_v36 }
   0xf   :  { %236 = vmatpush.bf16.msra.mxu2 %v1524_v37  ;;  %913 = vmatpush.bf16.msrb.mxu0 %v1520_v36 }
  0x10   :  { %1162 = vmatmul.msk.f32.gmra.mxu0 %vm60_vm1, %v48_v52 }
  0x12   :  { %224 = vmatpush.bf16.msra.mxu1 %v1540_v42  ;;  %339 = vmatpush.bf16.msra.mxu3 %v1540_v42 }
  0x13   :  { %237 = vmatpush.bf16.msra.mxu2 %v1544_v43  ;;  %914 = vmatpush.bf16.msrb.mxu0 %v1540_v42 }
  0x16   :  { %225 = vmatpush.bf16.msra.mxu1 %v1561_v49  ;;  %340 = vmatpush.bf16.msra.mxu3 %v1561_v49 }
  0x17   :  { %238 = vmatpush.bf16.msra.mxu2 %v1566_v51  ;;  %915 = vmatpush.bf16.msrb.mxu0 %v1561_v49 }
  0x1a   :  { %350 = vmatpush.bf16.msrb.mxu1 %v1511_v33  ;;  %465 = vmatpush.bf16.msrb.mxu3 %v1511_v33 }
  0x1b   :  { %452 = vmatpush.bf16.msrb.mxu2 %v1500_v29 }
  0x1e   :  { %351 = vmatpush.bf16.msrb.mxu1 %v1524_v37  ;;  %466 = vmatpush.bf16.msrb.mxu3 %v1524_v37 }
  0x1f   :  { %453 = vmatpush.bf16.msrb.mxu2 %v1520_v36 }
  0x22   :  { %352 = vmatpush.bf16.msrb.mxu1 %v1544_v43  ;;  %467 = vmatpush.bf16.msrb.mxu3 %v1544_v43 }
  0x23   :  { %454 = vmatpush.bf16.msrb.mxu2 %v1540_v42 }
  0x26   :  { %353 = vmatpush.bf16.msrb.mxu1 %v1566_v51  ;;  %468 = vmatpush.bf16.msrb.mxu3 %v1566_v51 }
  0x27   :  { %455 = vmatpush.bf16.msrb.mxu2 %v1561_v49 }
  0x82   :  { %v106_v4 = vpop.f32.mrf.mxu0 }
  0x83   :  { %v107_v5 = vadd.f32 %v1482_v3, %v106_v4 }
  0x85   :  { %1255 = vtanh.f32 %v107_v5  ;;  %v1169_v7 = vmul.f32 -1.442695, %v107_v5 }
  0x87   :  { %1257 = vpow2.f32 %v1169_v7 }
  0x8b   :  { %v1256_v6 = vpop.eup %1255 }
  0x8c   :  { %152 = vrot.lane.b32.xlu0 %v1256_v6, %s1413_s1 }
  0x8d   :  { %v1258_v8 = vpop.eup %1257  ;;  %v109_v58 = vpop.f32.mrf.mxu0 }
  0x8e   :  { %v133_v9 = vadd.f32 1.0, %v1258_v8  ;;  %v110_v60 = vadd.f32 %v1482_v3, %v109_v58 }
  0x90   :  { %1259 = vrcp.f32 %v133_v9  ;;  %v145_v15 = vand.u32 2147483648, %v133_v9  ;;  %vm139_vm3 = vweird.f32 %v133_v9  ;;  %v143_v16 = vand.u32 2147483647, %v133_v9 }
  0x92   :  { %v146_v18 = vor.u32 1.1754944e-38, %v145_v15  ;;  %vm144_vm5 = vcmp.eq.f32.partialorder %v143_v16, 8.507059e+37 }
  0x96   :  { %v1260_v10 = vpop.eup %1259 }
  0x97   :  { %v135_v11 = vmul.f32 %v1260_v10, %v133_v9  ;;  %vm140_vm2 = vweird.f32 %v1260_v10 }
  0x98   :  { %vm141_vm4 = vmor %vm139_vm3, %vm140_vm2 }
  0x99   :  { %v136_v12 = vsub.f32 1.0, %v135_v11 }
  0x9b   :  { %v137_v13 = vmul.f32 %v1260_v10, %v136_v12 }
  0x9d   :  { %v138_v14 = vadd.f32 %v1260_v10, %v137_v13 }
  0x9f   :  { %v142_v17 = vsel %vm141_vm4, %v1260_v10, %v138_v14 }
  0xa0   :  { %v147_v20 = vsel %vm144_vm5, %v146_v18, %v142_v17 }
  0xa1   :  { %v150_v22 = vmul.f32 0.0, %v147_v20 }
  0xfe   :  { %v153_v19 = vpop.permute.xlu0 %152 }
  0xff   :  { %v155_v21 = vmul.f32 %v153_v19, %v147_v20 }
 0x101   :  { %157 = vrot.lane.b32.xlu0 %v155_v21, %s1413_s1 }
 0x173   :  { %v158_v23 = vpop.permute.xlu0 %157 }
 0x174   :  { %v1487_v24 = vadd.f32 %v158_v23, %v150_v22 }
 0x176   :  { %1261 = vtanh.f32 %v1487_v24 }
 0x17c   :  { %v1262_v25 = vpop.eup %1261 }
 0x17d   :  { %163 = vrot.lane.b32.xlu1 %v1262_v25, %s1413_s1 }
 0x1ef   :  { %v164_v44 = vpop.permute.xlu1 %163 }
 0x1f0   :  { %v166_v45 = vmul.f32 %v164_v44, %v147_v20 }
 0x1f2   :  { %168 = vrot.lane.b32.xlu1 %v166_v45, %s1414_s18 }
 0x264   :  { %v169_v53 = vpop.permute.xlu1 %168 }
 0x265   :  { %v172_v54 = vsel %vm171_vm6, %v169_v53, 0.0 }
 0x266   :  { %v173_v55 = vpack.c.bf16 %v172_v54, %v172_v54 }
 0x268   :  { %1202 = vmatmul.msk.bf16.vlgmr.msra.gmra.mxu1 %vm214_vm7, %v173_v55  ;;  %1203 = vmatmul.msk.bf16.vlgmr.msra.gmra.mxu2 %vm214_vm7, %v173_v55 }
 0x269   :  { %580 = vmatpush.bf16.msra.mxu2 %v1511_v33  ;;  %567 = vmatpush.bf16.msra.mxu1 %v1500_v29 }
 0x26d   :  { %581 = vmatpush.bf16.msra.mxu2 %v1524_v37  ;;  %568 = vmatpush.bf16.msra.mxu1 %v1520_v36 }
 0x271   :  { %582 = vmatpush.bf16.msra.mxu2 %v1544_v43  ;;  %569 = vmatpush.bf16.msra.mxu1 %v1540_v42 }
 0x275   :  { %583 = vmatpush.bf16.msra.mxu2 %v1566_v51  ;;  %570 = vmatpush.bf16.msra.mxu1 %v1561_v49 }
 0x2e5   :  { %v227_v57 = vpop.f32.mrf.mxu1 }
 0x2e6   :  { %v244_v59 = vadd.f32 %v1602_v56, %v227_v57 }
 0x2e8   :  { %1263 = vtanh.f32 %v244_v59  ;;  %v1204_v4 = vmul.f32 -1.442695, %v244_v59 }
 0x2eb   :  { %v240_v61 = vpop.f32.mrf.mxu2 }
 0x2ec   :  { %v282_v62 = vadd.f32 %v240_v61, %v110_v60 }
 0x2ed   :  { %v229_v63 = vpop.f32.mrf.mxu1 }
 0x2ee   :  { %v1264_v0 = vpop.eup %1263  ;;  %1265 = vtanh.f32 %v282_v62  ;;  %v1205_v5 = vmul.f32 -1.442695, %v282_v62 }
 0x2ef   :  { %267 = vrot.lane.b32.xlu2 %v1264_v0, %s1413_s1  ;;  %1267 = vpow2.f32 %v1204_v4 }
 0x2f0   :  { %1269 = vpow2.f32 %v1205_v5 }
 0x2f3   :  { %v242_v1 = vpop.f32.mrf.mxu2 }
 0x2f4   :  { %v1266_v2 = vpop.eup %1265 }
 0x2f5   :  { %v1268_v6 = vpop.eup %1267 }
 0x2f6   :  { %v248_v7 = vadd.f32 1.0, %v1268_v6  ;;  %v1270_v8 = vpop.eup %1269 }
 0x2f7   :  { %305 = vrot.lane.b32.xlu2 %v1266_v2, %s1413_s1  ;;  %v286_v9 = vadd.f32 1.0, %v1270_v8 }
 0x2f8   :  { %1271 = vrcp.f32 %v248_v7  ;;  %v260_v18 = vand.u32 2147483648, %v248_v7  ;;  %vm254_vm9 = vweird.f32 %v248_v7  ;;  %v258_v19 = vand.u32 2147483647, %v248_v7 }
 0x2f9   :  { %1273 = vrcp.f32 %v286_v9  ;;  %v298_v28 = vand.u32 2147483648, %v286_v9  ;;  %vm292_vm13 = vweird.f32 %v286_v9  ;;  %v296_v30 = vand.u32 2147483647, %v286_v9 }
 0x2fa   :  { %v261_v22 = vor.u32 1.1754944e-38, %v260_v18  ;;  %vm259_vm11 = vcmp.eq.f32.partialorder %v258_v19, 8.507059e+37 }
 0x2fb   :  { %v299_v32 = vor.u32 1.1754944e-38, %v298_v28  ;;  %vm297_vm15 = vcmp.eq.f32.partialorder %v296_v30, 8.507059e+37 }
 0x2fe   :  { %v1272_v10 = vpop.eup %1271 }
 0x2ff   :  { %v250_v11 = vmul.f32 %v1272_v10, %v248_v7  ;;  %v1274_v13 = vpop.eup %1273  ;;  %vm255_vm8 = vweird.f32 %v1272_v10 }
 0x300   :  { %v288_v15 = vmul.f32 %v1274_v13, %v286_v9  ;;  %vm256_vm10 = vmor %vm254_vm9, %vm255_vm8  ;;  %vm293_vm12 = vweird.f32 %v1274_v13 }
 0x301   :  { %v251_v12 = vsub.f32 1.0, %v250_v11  ;;  %vm294_vm14 = vmor %vm292_vm13, %vm293_vm12 }
 0x302   :  { %v289_v17 = vsub.f32 1.0, %v288_v15 }
 0x303   :  { %v252_v14 = vmul.f32 %v1272_v10, %v251_v12 }
 0x304   :  { %v290_v21 = vmul.f32 %v1274_v13, %v289_v17 }
 0x305   :  { %v253_v16 = vadd.f32 %v1272_v10, %v252_v14 }
 0x306   :  { %v291_v27 = vadd.f32 %v1274_v13, %v290_v21 }
 0x307   :  { %v257_v20 = vsel %vm256_vm10, %v1272_v10, %v253_v16 }
 0x308   :  { %v262_v25 = vsel %vm259_vm11, %v261_v22, %v257_v20  ;;  %v295_v31 = vsel %vm294_vm14, %v1274_v13, %v291_v27 }
 0x309   :  { %v300_v35 = vsel %vm297_vm15, %v299_v32, %v295_v31  ;;  %v265_v39 = vmul.f32 0.0, %v262_v25 }
 0x30a   :  { %v303_v44 = vmul.f32 %v300_v35, %v1487_v24  ;;  %v49_v24 = vld [vmem:[%s1828_s0 + $0x10] sm:$0xff] }
 0x30b   :  { %1163 = vmatmul.msk.f32.gmra.mxu0 %vm60_vm1, %v49_v24 }
 0x349   :  { %v268_v23 = vpop.permute.xlu2 %267 }
 0x34a   :  { %v270_v26 = vmul.f32 %v268_v23, %v262_v25 }
 0x34c   :  { %272 = vrot.lane.b32.xlu0 %v270_v26, %s1413_s1 }
 0x351   :  { %v306_v34 = vpop.permute.xlu2 %305 }
 0x352   :  { %v308_v38 = vmul.f32 %v306_v34, %v300_v35 }
 0x354   :  { %310 = vrot.lane.b32.xlu1 %v308_v38, %s1413_s1 }
 0x388   :  { %v112_v60 = vpop.f32.mrf.mxu0 }
 0x389   :  { %v113_v61 = vadd.f32 %v1482_v3, %v112_v60 }
 0x3be   :  { %v273_v40 = vpop.permute.xlu0 %272 }
 0x3bf   :  { %v1610_v41 = vadd.f32 %v273_v40, %v265_v39 }
 0x3c1   :  { %1275 = vtanh.f32 %v1610_v41 }
 0x3c6   :  { %v311_v45 = vpop.permute.xlu1 %310 }
 0x3c7   :  { %v1276_v46 = vpop.eup %1275  ;;  %v1614_v47 = vadd.f32 %v311_v45, %v303_v44 }
 0x3c8   :  { %278 = vrot.lane.b32.xlu2 %v1276_v46, %s1413_s1 }
 0x3c9   :  { %1277 = vtanh.f32 %v1614_v47 }
 0x3cf   :  { %v1278_v48 = vpop.eup %1277 }
 0x3d0   :  { %316 = vrot.lane.b32.xlu0 %v1278_v48, %s1413_s1 }
 0x422   :  { %v279_v50 = vpop.permute.xlu2 %278 }
 0x423   :  { %v281_v52 = vmul.f32 %v279_v50, %v262_v25 }
 0x425   :  { %325 = vrot.lane.b32.xlu2 %v281_v52, %s1415_s30 }
 0x442   :  { %v317_v53 = vpop.permute.xlu0 %316 }
 0x443   :  { %v319_v54 = vmul.f32 %v317_v53, %v300_v35 }
 0x445   :  { %321 = vrot.lane.b32.xlu1 %v319_v54, %s1414_s18 }
 0x47f   :  { %v326_v55 = vpop.permute.xlu2 %325 }
 0x4b7   :  { %v322_v57 = vpop.permute.xlu1 %321 }
 0x4b8   :  { %v328_v58 = vsel %vm171_vm6, %v322_v57, %v326_v55 }
 0x4b9   :  { %v329_v59 = vpack.c.bf16 %v328_v58, %v328_v58 }
 0x4bb   :  { %1206 = vmatmul.msk.bf16.vlgmr.msra.gmra.mxu3 %vm214_vm7, %v329_v59  ;;  %1207 = vmatmul.msk.bf16.vlgmr.msrb.gmra.mxu1 %vm214_vm7, %v329_v59 }
 0x4bc   :  { %682 = vmatpush.bf16.msra.mxu3 %v1500_v29  ;;  %695 = vmatpush.bf16.msrb.mxu1 %v1511_v33 }
 0x4c0   :  { %683 = vmatpush.bf16.msra.mxu3 %v1520_v36  ;;  %696 = vmatpush.bf16.msrb.mxu1 %v1524_v37 }
 0x4c4   :  { %684 = vmatpush.bf16.msra.mxu3 %v1540_v42  ;;  %697 = vmatpush.bf16.msrb.mxu1 %v1544_v43 }
 0x4c8   :  { %685 = vmatpush.bf16.msra.mxu3 %v1561_v49  ;;  %698 = vmatpush.bf16.msrb.mxu1 %v1566_v51 }
 0x538   :  { %v355_v62 = vpop.f32.mrf.mxu1 }
 0x539   :  { %v397_v63 = vadd.f32 %v355_v62, %v113_v61 }
 0x53b   :  { %1279 = vtanh.f32 %v397_v63  ;;  %v1209_v7 = vmul.f32 -1.442695, %v397_v63 }
 0x53e   :  { %v342_v0 = vpop.f32.mrf.mxu3 }
 0x53f   :  { %v359_v1 = vadd.f32 %v1602_v56, %v342_v0 }
 0x540   :  { %v357_v2 = vpop.f32.mrf.mxu1 }
 0x541   :  { %v1280_v4 = vpop.eup %1279  ;;  %1281 = vtanh.f32 %v359_v1  ;;  %v1208_v8 = vmul.f32 -1.442695, %v359_v1 }
 0x542   :  { %420 = vrot.lane.b32.xlu1 %v1280_v4, %s1413_s1  ;;  %1283 = vpow2.f32 %v1209_v7 }
 0x543   :  { %1285 = vpow2.f32 %v1208_v8 }
 0x546   :  { %v344_v5 = vpop.f32.mrf.mxu3 }
 0x547   :  { %v1282_v6 = vpop.eup %1281 }
 0x548   :  { %382 = vrot.lane.b32.xlu0 %v1282_v6, %s1413_s1  ;;  %v1284_v9 = vpop.eup %1283 }
 0x549   :  { %v401_v10 = vadd.f32 1.0, %v1284_v9  ;;  %v1286_v11 = vpop.eup %1285 }
 0x54a   :  { %v363_v12 = vadd.f32 1.0, %v1286_v11 }
 0x54b   :  { %1287 = vrcp.f32 %v401_v10  ;;  %v413_v21 = vand.u32 2147483648, %v401_v10  ;;  %vm407_vm2 = vweird.f32 %v401_v10  ;;  %v411_v22 = vand.u32 2147483647, %v401_v10 }
 0x54c   :  { %1289 = vrcp.f32 %v363_v12  ;;  %v375_v31 = vand.u32 2147483648, %v363_v12  ;;  %vm369_vm8 = vweird.f32 %v363_v12  ;;  %v373_v34 = vand.u32 2147483647, %v363_v12 }
 0x54d   :  { %v414_v26 = vor.u32 1.1754944e-38, %v413_v21  ;;  %vm412_vm4 = vcmp.eq.f32.partialorder %v411_v22, 8.507059e+37 }
 0x54e   :  { %v376_v38 = vor.u32 1.1754944e-38, %v375_v31  ;;  %vm374_vm10 = vcmp.eq.f32.partialorder %v373_v34, 8.507059e+37 }
 0x551   :  { %v1288_v13 = vpop.eup %1287 }
 0x552   :  { %v403_v14 = vmul.f32 %v1288_v13, %v401_v10  ;;  %v1290_v15 = vpop.eup %1289  ;;  %vm408_vm0 = vweird.f32 %v1288_v13 }
 0x553   :  { %v365_v17 = vmul.f32 %v1290_v15, %v363_v12  ;;  %vm409_vm3 = vmor %vm407_vm2, %vm408_vm0  ;;  %vm370_vm5 = vweird.f32 %v1290_v15 }
 0x554   :  { %v404_v16 = vsub.f32 1.0, %v403_v14  ;;  %vm371_vm9 = vmor %vm369_vm8, %vm370_vm5 }
 0x555   :  { %v366_v19 = vsub.f32 1.0, %v365_v17 }
 0x556   :  { %v405_v18 = vmul.f32 %v1288_v13, %v404_v16 }
 0x557   :  { %v367_v23 = vmul.f32 %v1290_v15, %v366_v19 }
 0x558   :  { %v406_v20 = vadd.f32 %v1288_v13, %v405_v18 }
 0x559   :  { %v368_v27 = vadd.f32 %v1290_v15, %v367_v23 }
 0x55a   :  { %v410_v25 = vsel %vm409_vm3, %v1288_v13, %v406_v20 }
 0x55b   :  { %v415_v30 = vsel %vm412_vm4, %v414_v26, %v410_v25  ;;  %v372_v35 = vsel %vm371_vm9, %v1290_v15, %v368_v27 }
 0x55c   :  { %v377_v40 = vsel %vm374_vm10, %v376_v38, %v372_v35  ;;  %v418_v52 = vmul.f32 %v415_v30, %v1614_v47  ;;  %v50_v47 = vld [vmem:[%s1828_s0 + $0x18] sm:$0xff] }
 0x55d   :  { %v380_v45 = vmul.f32 %v377_v40, %v1610_v41  ;;  %1164 = vmatmul.msk.f32.gmra.mxu0 %vm60_vm1, %v50_v47 }
 0x5b4   :  { %v421_v28 = vpop.permute.xlu1 %420 }
 0x5b5   :  { %v423_v32 = vmul.f32 %v421_v28, %v415_v30 }
 0x5b7   :  { %425 = vrot.lane.b32.xlu0 %v423_v32, %s1413_s1 }
 0x5ba   :  { %v383_v39 = vpop.permute.xlu0 %382 }
 0x5bb   :  { %v385_v44 = vmul.f32 %v383_v39, %v377_v40 }
 0x5bd   :  { %387 = vrot.lane.b32.xlu2 %v385_v44, %s1413_s1 }
 0x5da   :  { %v115_v63 = vpop.f32.mrf.mxu0 }
 0x5db   :  { %v116_v0 = vadd.f32 %v1482_v3, %v115_v63 }
 0x617   :  { %v388_v46 = vpop.permute.xlu2 %387 }
 0x618   :  { %v1643_v48 = vadd.f32 %v388_v46, %v380_v45 }
 0x61a   :  { %1291 = vtanh.f32 %v1643_v48 }
 0x620   :  { %v1292_v50 = vpop.eup %1291 }
 0x621   :  { %393 = vrot.lane.b32.xlu1 %v1292_v50, %s1413_s1 }
 0x629   :  { %v426_v53 = vpop.permute.xlu0 %425 }
 0x62a   :  { %v1648_v54 = vadd.f32 %v426_v53, %v418_v52 }
 0x62c   :  { %1293 = vtanh.f32 %v1648_v54 }
 0x632   :  { %v1294_v24 = vpop.eup %1293 }
 0x633   :  { %431 = vrot.lane.b32.xlu2 %v1294_v24, %s1413_s1 }
 0x68d   :  { %v432_v55 = vpop.permute.xlu2 %431 }
 0x68e   :  { %v434_v41 = vmul.f32 %v432_v55, %v415_v30 }
 0x690   :  { %436 = vrot.lane.b32.xlu0 %v434_v41, %s1414_s18 }
 0x693   :  { %v394_v57 = vpop.permute.xlu1 %393 }
 0x694   :  { %v396_v58 = vmul.f32 %v394_v57, %v377_v40 }
 0x696   :  { %440 = vrot.lane.b32.xlu1 %v396_v58, %s1415_s30 }
 0x702   :  { %v437_v59 = vpop.permute.xlu0 %436 }
 0x708   :  { %v441_v60 = vpop.permute.xlu1 %440 }
 0x709   :  { %v443_v61 = vsel %vm171_vm6, %v437_v59, %v441_v60 }
 0x70a   :  { %v444_v62 = vpack.c.bf16 %v443_v61, %v443_v61  ;;  %v51_v61 = vld [vmem:[%s1828_s0 + $0x20] sm:$0xff] }
 0x70b   :  { %1165 = vmatmul.msk.f32.gmra.mxu0 %vm60_vm1, %v51_v61 }
 0x70c   :  { %1210 = vmatmul.msk.bf16.vlgmr.msrb.gmra.mxu2 %vm214_vm7, %v444_v62  ;;  %1211 = vmatmul.msk.bf16.vlgmr.msrb.gmra.mxu3 %vm214_vm7, %v444_v62 }
 0x70d   :  { %797 = vmatpush.bf16.msrb.mxu2 %v1500_v29  ;;  %810 = vmatpush.bf16.msrb.mxu3 %v1511_v33 }
 0x711   :  { %798 = vmatpush.bf16.msrb.mxu2 %v1520_v36  ;;  %811 = vmatpush.bf16.msrb.mxu3 %v1524_v37 }
 0x715   :  { %799 = vmatpush.bf16.msrb.mxu2 %v1540_v42  ;;  %812 = vmatpush.bf16.msrb.mxu3 %v1544_v43 }
 0x719   :  { %800 = vmatpush.bf16.msrb.mxu2 %v1561_v49  ;;  %813 = vmatpush.bf16.msrb.mxu3 %v1566_v51 }
 0x78f   :  { %v457_v1 = vpop.f32.mrf.mxu2  ;;  %v470_v2 = vpop.f32.mrf.mxu3 }
 0x790   :  { %v474_v4 = vadd.f32 %v1602_v56, %v457_v1  ;;  %v512_v5 = vadd.f32 %v470_v2, %v116_v0 }
 0x792   :  { %1295 = vtanh.f32 %v474_v4  ;;  %v1212_v10 = vmul.f32 -1.442695, %v474_v4  ;;  %v1213_v14 = vmul.f32 -1.442695, %v512_v5  ;;  %v118_v4 = vpop.f32.mrf.mxu0 }
 0x793   :  { %1297 = vtanh.f32 %v512_v5 }
 0x794   :  { %1299 = vpow2.f32 %v1212_v10 }
 0x797   :  { %v459_v6 = vpop.f32.mrf.mxu2  ;;  %v472_v7 = vpop.f32.mrf.mxu3 }
 0x798   :  { %v1296_v8 = vpop.eup %1295 }
 0x799   :  { %v1298_v9 = vpop.eup %1297  ;;  %497 = vrot.lane.b32.xlu2 %v1296_v8, %s1413_s1 }
 0x79a   :  { %535 = vrot.lane.b32.xlu0 %v1298_v9, %s1413_s1  ;;  %v1300_v11 = vpop.eup %1299 }
 0x79b   :  { %v478_v12 = vadd.f32 1.0, %v1300_v11 }
 0x79d   :  { %1301 = vrcp.f32 %v478_v12  ;;  %v490_v21 = vand.u32 2147483648, %v478_v12  ;;  %vm484_vm12 = vweird.f32 %v478_v12  ;;  %v488_v22 = vand.u32 2147483647, %v478_v12 }
 0x79e   :  { %1303 = vpow2.f32 %v1213_v14 }
 0x79f   :  { %v491_v25 = vor.u32 1.1754944e-38, %v490_v21  ;;  %vm489_vm14 = vcmp.eq.f32.partialorder %v488_v22, 8.507059e+37 }
 0x7a3   :  { %v1302_v13 = vpop.eup %1301 }
 0x7a4   :  { %v480_v15 = vmul.f32 %v1302_v13, %v478_v12  ;;  %v1304_v18 = vpop.eup %1303  ;;  %vm485_vm11 = vweird.f32 %v1302_v13 }
 0x7a5   :  { %v516_v19 = vadd.f32 1.0, %v1304_v18  ;;  %vm486_vm13 = vmor %vm484_vm12, %vm485_vm11 }
 0x7a6   :  { %v481_v16 = vsub.f32 1.0, %v480_v15 }
 0x7a7   :  { %1305 = vrcp.f32 %v516_v19  ;;  %v528_v38 = vand.u32 2147483648, %v516_v19  ;;  %vm522_vm0 = vweird.f32 %v516_v19  ;;  %v526_v39 = vand.u32 2147483647, %v516_v19 }
 0x7a8   :  { %v482_v17 = vmul.f32 %v1302_v13, %v481_v16 }
 0x7a9   :  { %v529_v44 = vor.u32 1.1754944e-38, %v528_v38  ;;  %vm527_vm3 = vcmp.eq.f32.partialorder %v526_v39, 8.507059e+37 }
 0x7aa   :  { %v483_v20 = vadd.f32 %v1302_v13, %v482_v17 }
 0x7ac   :  { %v487_v23 = vsel %vm486_vm13, %v1302_v13, %v483_v20 }
 0x7ad   :  { %v492_v27 = vsel %vm489_vm14, %v491_v25, %v487_v23  ;;  %v1306_v30 = vpop.eup %1305 }
 0x7ae   :  { %v518_v31 = vmul.f32 %v1306_v30, %v516_v19  ;;  %vm523_vm15 = vweird.f32 %v1306_v30  ;;  %v495_v52 = vmul.f32 %v492_v27, %v1643_v48 }
 0x7af   :  { %vm524_vm2 = vmor %vm522_vm0, %vm523_vm15 }
 0x7b0   :  { %v519_v32 = vsub.f32 1.0, %v518_v31 }
 0x7b2   :  { %v520_v34 = vmul.f32 %v1306_v30, %v519_v32 }
 0x7b4   :  { %v521_v35 = vadd.f32 %v1306_v30, %v520_v34 }
 0x7b6   :  { %v525_v40 = vsel %vm524_vm2, %v1306_v30, %v521_v35 }
 0x7b7   :  { %v530_v46 = vsel %vm527_vm3, %v529_v44, %v525_v40 }
 0x7b8   :  { %v533_v53 = vmul.f32 %v530_v46, %v1648_v54 }
 0x7f3   :  { %v498_v26 = vpop.permute.xlu2 %497 }
 0x7f4   :  { %v500_v28 = vmul.f32 %v498_v26, %v492_v27 }
 0x7f6   :  { %502 = vrot.lane.b32.xlu1 %v500_v28, %s1413_s1 }
 0x80c   :  { %v536_v45 = vpop.permute.xlu0 %535 }
 0x80d   :  { %v538_v50 = vmul.f32 %v536_v45, %v530_v46 }
 0x80f   :  { %540 = vrot.lane.b32.xlu2 %v538_v50, %s1413_s1 }
 0x868   :  { %v503_v24 = vpop.permute.xlu1 %502 }
 0x869   :  { %v541_v55 = vpop.permute.xlu2 %540  ;;  %v1677_v41 = vadd.f32 %v503_v24, %v495_v52 }
 0x86a   :  { %v1679_v57 = vadd.f32 %v541_v55, %v533_v53 }
 0x86b   :  { %1307 = vtanh.f32 %v1677_v41 }
 0x86c   :  { %1309 = vtanh.f32 %v1679_v57 }
 0x871   :  { %v1308_v58 = vpop.eup %1307 }
 0x872   :  { %v1310_v47 = vpop.eup %1309  ;;  %508 = vrot.lane.b32.xlu0 %v1308_v58, %s1413_s1 }
 0x873   :  { %546 = vrot.lane.b32.xlu1 %v1310_v47, %s1413_s1 }
 0x8e4   :  { %v509_v59 = vpop.permute.xlu0 %508 }
 0x8e5   :  { %v547_v48 = vpop.permute.xlu1 %546  ;;  %v511_v60 = vmul.f32 %v509_v59, %v492_v27 }
 0x8e6   :  { %v549_v54 = vmul.f32 %v547_v48, %v530_v46 }
 0x8e7   :  { %555 = vrot.lane.b32.xlu0 %v511_v60, %s1415_s30 }
 0x8e8   :  { %551 = vrot.lane.b32.xlu2 %v549_v54, %s1414_s18 }
 0x942   :  { %v552_v62 = vpop.permute.xlu2 %551 }
 0x959   :  { %v556_v63 = vpop.permute.xlu0 %555 }
 0x95a   :  { %v558_v0 = vsel %vm171_vm6, %v552_v62, %v556_v63 }
 0x95b   :  { %v559_v1 = vpack.c.bf16 %v558_v0, %v558_v0 }
 0x95d   :  { %1214 = vmatmul.msk.bf16.vlgmr.msra.gmra.mxu1 %vm214_vm7, %v559_v1  ;;  %1215 = vmatmul.msk.bf16.vlgmr.msra.gmra.mxu2 %vm214_vm7, %v559_v1 }
 0x95e   :  { %925 = vmatpush.bf16.msra.mxu1 %v1511_v33  ;;  %1027 = vmatpush.bf16.msra.mxu2 %v1500_v29  ;;  %v119_v33 = vadd.f32 %v1482_v3, %v118_v4 }
 0x962   :  { %926 = vmatpush.bf16.msra.mxu1 %v1524_v37  ;;  %1028 = vmatpush.bf16.msra.mxu2 %v1520_v36 }
 0x966   :  { %927 = vmatpush.bf16.msra.mxu1 %v1544_v43  ;;  %1029 = vmatpush.bf16.msra.mxu2 %v1540_v42 }
 0x96a   :  { %928 = vmatpush.bf16.msra.mxu1 %v1566_v51  ;;  %1030 = vmatpush.bf16.msra.mxu2 %v1561_v49 }
 0x9da   :  { %v572_v2 = vpop.f32.mrf.mxu1 }
 0x9db   :  { %v589_v5 = vadd.f32 %v1602_v56, %v572_v2 }
 0x9dd   :  { %1311 = vtanh.f32 %v589_v5  ;;  %v1216_v8 = vmul.f32 -1.442695, %v589_v5 }
 0x9e0   :  { %v585_v29 = vpop.f32.mrf.mxu2 }
 0x9e1   :  { %v627_v6 = vadd.f32 %v585_v29, %v119_v33 }
 0x9e2   :  { %v574_v37 = vpop.f32.mrf.mxu1 }
 0x9e3   :  { %v1312_v7 = vpop.eup %1311  ;;  %1313 = vtanh.f32 %v627_v6  ;;  %v1217_v43 = vmul.f32 -1.442695, %v627_v6 }
 0x9e4   :  { %612 = vrot.lane.b32.xlu1 %v1312_v7, %s1413_s1 }
 0x9e5   :  { %1315 = vpow2.f32 %v1217_v43 }
 0x9e8   :  { %v587_v36 = vpop.f32.mrf.mxu2 }
 0x9e9   :  { %v1314_v42 = vpop.eup %1313 }
 0x9ea   :  { %650 = vrot.lane.b32.xlu2 %v1314_v42, %s1413_s1 }
 0x9eb   :  { %v1316_v49 = vpop.eup %1315 }
 0x9ec   :  { %v631_v51 = vadd.f32 1.0, %v1316_v49 }
 0x9ee   :  { %1317 = vrcp.f32 %v631_v51  ;;  %v643_v16 = vand.u32 2147483648, %v631_v51  ;;  %vm637_vm5 = vweird.f32 %v631_v51  ;;  %v641_v17 = vand.u32 2147483647, %v631_v51 }
 0x9ef   :  { %1319 = vpow2.f32 %v1216_v8 }
 0x9f0   :  { %v644_v20 = vor.u32 1.1754944e-38, %v643_v16  ;;  %vm642_vm9 = vcmp.eq.f32.partialorder %v641_v17, 8.507059e+37 }
 0x9f4   :  { %v1318_v9 = vpop.eup %1317 }
 0x9f5   :  { %v633_v10 = vmul.f32 %v1318_v9, %v631_v51  ;;  %v1320_v11 = vpop.eup %1319  ;;  %vm638_vm4 = vweird.f32 %v1318_v9 }
 0x9f6   :  { %v593_v13 = vadd.f32 1.0, %v1320_v11  ;;  %vm639_vm8 = vmor %vm637_vm5, %vm638_vm4 }
 0x9f7   :  { %v634_v12 = vsub.f32 1.0, %v633_v10 }
 0x9f8   :  { %1321 = vrcp.f32 %v593_v13  ;;  %v605_v30 = vand.u32 2147483648, %v593_v13  ;;  %vm599_vm11 = vweird.f32 %v593_v13  ;;  %v603_v31 = vand.u32 2147483647, %v593_v13 }
 0x9f9   :  { %v635_v14 = vmul.f32 %v1318_v9, %v634_v12 }
 0x9fa   :  { %v606_v34 = vor.u32 1.1754944e-38, %v605_v30  ;;  %vm604_vm13 = vcmp.eq.f32.partialorder %v603_v31, 8.507059e+37 }
 0x9fb   :  { %v636_v15 = vadd.f32 %v1318_v9, %v635_v14 }
 0x9fd   :  { %v640_v19 = vsel %vm639_vm8, %v1318_v9, %v636_v15 }
 0x9fe   :  { %v1322_v18 = vpop.eup %1321  ;;  %v645_v23 = vsel %vm642_vm9, %v644_v20, %v640_v19 }
 0x9ff   :  { %v595_v21 = vmul.f32 %v1322_v18, %v593_v13  ;;  %vm600_vm10 = vweird.f32 %v1322_v18  ;;  %v648_v40 = vmul.f32 %v645_v23, %v1679_v57 }
 0xa00   :  { %vm601_vm12 = vmor %vm599_vm11, %vm600_vm10 }
 0xa01   :  { %v596_v26 = vsub.f32 1.0, %v595_v21 }
 0xa03   :  { %v597_v27 = vmul.f32 %v1322_v18, %v596_v26 }
 0xa05   :  { %v598_v28 = vadd.f32 %v1322_v18, %v597_v27 }
 0xa07   :  { %v602_v32 = vsel %vm601_vm12, %v1322_v18, %v598_v28 }
 0xa08   :  { %v607_v38 = vsel %vm604_vm13, %v606_v34, %v602_v32 }
 0xa09   :  { %v610_v50 = vmul.f32 %v607_v38, %v1677_v41  ;;  %v52_v41 = vld [vmem:[%s1828_s0 + $0x28] sm:$0xff] }
 0xa0a   :  { %1166 = vmatmul.msk.f32.gmra.mxu0 %vm60_vm1, %v52_v41  ;;  %v1755_v41 = vld [vmem:[%s1830_s2] ss:$0 sm:$0xff] }
 0xa44   :  { %v651_v22 = vpop.permute.xlu2 %650 }
 0xa45   :  { %v653_v25 = vmul.f32 %v651_v22, %v645_v23 }
 0xa47   :  { %655 = vrot.lane.b32.xlu1 %v653_v25, %s1413_s1 }
 0xa56   :  { %v613_v35 = vpop.permute.xlu1 %612 }
 0xa57   :  { %v615_v39 = vmul.f32 %v613_v35, %v607_v38 }
 0xa59   :  { %617 = vrot.lane.b32.xlu0 %v615_v39, %s1413_s1 }
 0xa87   :  { %v121_v61 = vpop.f32.mrf.mxu0 }
 0xa88   :  { %v122_v62 = vadd.f32 %v1482_v3, %v121_v61 }
 0xab9   :  { %v656_v44 = vpop.permute.xlu1 %655 }
 0xaba   :  { %v1709_v45 = vadd.f32 %v656_v44, %v648_v40 }
 0xabc   :  { %1323 = vtanh.f32 %v1709_v45 }
 0xac2   :  { %v1324_v46 = vpop.eup %1323 }
 0xac3   :  { %661 = vrot.lane.b32.xlu0 %v1324_v46, %s1413_s1 }
 0xacb   :  { %v618_v52 = vpop.permute.xlu0 %617 }
 0xacc   :  { %v1714_v53 = vadd.f32 %v618_v52, %v610_v50 }
 0xace   :  { %1325 = vtanh.f32 %v1714_v53 }
 0xad4   :  { %v1326_v24 = vpop.eup %1325 }
 0xad5   :  { %623 = vrot.lane.b32.xlu2 %v1326_v24, %s1413_s1 }
 0xb2f   :  { %v624_v55 = vpop.permute.xlu2 %623 }
 0xb30   :  { %v626_v57 = vmul.f32 %v624_v55, %v607_v38 }
 0xb32   :  { %670 = vrot.lane.b32.xlu2 %v626_v57, %s1415_s30 }
 0xb35   :  { %v662_v58 = vpop.permute.xlu0 %661 }
 0xb36   :  { %v664_v47 = vmul.f32 %v662_v58, %v645_v23 }
 0xb38   :  { %666 = vrot.lane.b32.xlu1 %v664_v47, %s1414_s18 }
 0xb8c   :  { %v671_v59 = vpop.permute.xlu2 %670 }
 0xbaa   :  { %v667_v48 = vpop.permute.xlu1 %666 }
 0xbab   :  { %v673_v60 = vsel %vm171_vm6, %v667_v48, %v671_v59 }
 0xbac   :  { %v674_v54 = vpack.c.bf16 %v673_v60, %v673_v60 }
 0xbae   :  { %1218 = vmatmul.msk.bf16.vlgmr.msra.gmra.mxu3 %vm214_vm7, %v674_v54  ;;  %1219 = vmatmul.msk.bf16.vlgmr.msrb.gmra.mxu1 %vm214_vm7, %v674_v54 }
 0xc2b   :  { %v700_v63 = vpop.f32.mrf.mxu1 }
 0xc2c   :  { %v742_v0 = vadd.f32 %v700_v63, %v122_v62 }
 0xc2e   :  { %1327 = vtanh.f32 %v742_v0  ;;  %v1221_v6 = vmul.f32 -1.442695, %v742_v0 }
 0xc31   :  { %v687_v1 = vpop.f32.mrf.mxu3 }
 0xc32   :  { %v704_v2 = vadd.f32 %v1602_v56, %v687_v1 }
 0xc33   :  { %v702_v4 = vpop.f32.mrf.mxu1 }
 0xc34   :  { %v1328_v5 = vpop.eup %1327  ;;  %1329 = vtanh.f32 %v704_v2  ;;  %v1220_v37 = vmul.f32 -1.442695, %v704_v2 }
 0xc35   :  { %765 = vrot.lane.b32.xlu1 %v1328_v5, %s1413_s1  ;;  %1331 = vpow2.f32 %v1221_v6 }
 0xc36   :  { %1333 = vpow2.f32 %v1220_v37 }
 0xc39   :  { %v689_v33 = vpop.f32.mrf.mxu3 }
 0xc3a   :  { %v1330_v29 = vpop.eup %1329 }
 0xc3b   :  { %727 = vrot.lane.b32.xlu0 %v1330_v29, %s1413_s1  ;;  %v1332_v7 = vpop.eup %1331 }
 0xc3c   :  { %v746_v3 = vadd.f32 1.0, %v1332_v7  ;;  %v1334_v36 = vpop.eup %1333 }
 0xc3d   :  { %v708_v42 = vadd.f32 1.0, %v1334_v36 }
 0xc3e   :  { %1335 = vrcp.f32 %v746_v3  ;;  %v758_v13 = vand.u32 2147483648, %v746_v3  ;;  %vm752_vm15 = vweird.f32 %v746_v3  ;;  %v756_v14 = vand.u32 2147483647, %v746_v3 }
 0xc3f   :  { %1337 = vrcp.f32 %v708_v42  ;;  %v720_v21 = vand.u32 2147483648, %v708_v42  ;;  %vm714_vm4 = vweird.f32 %v708_v42  ;;  %v718_v23 = vand.u32 2147483647, %v708_v42 }
 0xc40   :  { %v759_v17 = vor.u32 1.1754944e-38, %v758_v13  ;;  %vm757_vm2 = vcmp.eq.f32.partialorder %v756_v14, 8.507059e+37 }
 0xc41   :  { %v721_v26 = vor.u32 1.1754944e-38, %v720_v21  ;;  %vm719_vm8 = vcmp.eq.f32.partialorder %v718_v23, 8.507059e+37 }
 0xc44   :  { %v1336_v43 = vpop.eup %1335 }
 0xc45   :  { %v748_v49 = vmul.f32 %v1336_v43, %v746_v3  ;;  %v1338_v51 = vpop.eup %1337  ;;  %vm753_vm14 = vweird.f32 %v1336_v43 }
 0xc46   :  { %v710_v9 = vmul.f32 %v1338_v51, %v708_v42  ;;  %vm754_vm0 = vmor %vm752_vm15, %vm753_vm14  ;;  %vm715_vm3 = vweird.f32 %v1338_v51 }
 0xc47   :  { %v749_v8 = vsub.f32 1.0, %v748_v49  ;;  %vm716_vm5 = vmor %vm714_vm4, %vm715_vm3 }
 0xc48   :  { %v711_v11 = vsub.f32 1.0, %v710_v9 }
 0xc49   :  { %v750_v10 = vmul.f32 %v1336_v43, %v749_v8 }
 0xc4a   :  { %v712_v15 = vmul.f32 %v1338_v51, %v711_v11 }
 0xc4b   :  { %v751_v12 = vadd.f32 %v1336_v43, %v750_v10 }
 0xc4c   :  { %v713_v18 = vadd.f32 %v1338_v51, %v712_v15 }
 0xc4d   :  { %v755_v16 = vsel %vm754_vm0, %v1336_v43, %v751_v12 }
 0xc4e   :  { %v760_v20 = vsel %vm757_vm2, %v759_v17, %v755_v16  ;;  %v717_v25 = vsel %vm716_vm5, %v1338_v51, %v713_v18 }
 0xc4f   :  { %v722_v28 = vsel %vm719_vm8, %v721_v26, %v717_v25  ;;  %v763_v38 = vmul.f32 %v760_v20, %v1709_v45  ;;  %v53_v45 = vld [vmem:[%s1828_s0 + $0x30] sm:$0xff] }
 0xc50   :  { %v725_v31 = vmul.f32 %v722_v28, %v1714_v53  ;;  %1167 = vmatmul.msk.f32.gmra.mxu0 %vm60_vm1, %v53_v45 }
 0xca7   :  { %v766_v19 = vpop.permute.xlu1 %765 }
 0xca8   :  { %v768_v22 = vmul.f32 %v766_v19, %v760_v20 }
 0xcaa   :  { %770 = vrot.lane.b32.xlu0 %v768_v22, %s1413_s1 }
 0xcad   :  { %v728_v27 = vpop.permute.xlu0 %727 }
 0xcae   :  { %v730_v30 = vmul.f32 %v728_v27, %v722_v28 }
 0xcb0   :  { %732 = vrot.lane.b32.xlu2 %v730_v30, %s1413_s1 }
 0xccd   :  { %v124_v47 = vpop.f32.mrf.mxu0 }
 0xcce   :  { %v125_v59 = vadd.f32 %v1755_v41, %v124_v47 }
 0xd0a   :  { %v733_v32 = vpop.permute.xlu2 %732 }
 0xd0b   :  { %v1734_v34 = vadd.f32 %v733_v32, %v725_v31 }
 0xd0d   :  { %1339 = vtanh.f32 %v1734_v34 }
 0xd13   :  { %v1340_v35 = vpop.eup %1339 }
 0xd14   :  { %738 = vrot.lane.b32.xlu1 %v1340_v35, %s1413_s1 }
 0xd1c   :  { %v771_v39 = vpop.permute.xlu0 %770 }
 0xd1d   :  { %v1739_v40 = vadd.f32 %v771_v39, %v763_v38 }
 0xd1f   :  { %1341 = vtanh.f32 %v1739_v40 }
 0xd25   :  { %v1342_v44 = vpop.eup %1341 }
 0xd26   :  { %776 = vrot.lane.b32.xlu2 %v1342_v44, %s1413_s1 }
 0xd80   :  { %v777_v46 = vpop.permute.xlu2 %776 }
 0xd81   :  { %v779_v50 = vmul.f32 %v777_v46, %v760_v20 }
 0xd83   :  { %781 = vrot.lane.b32.xlu0 %v779_v50, %s1414_s18 }
 0xd86   :  { %v739_v52 = vpop.permute.xlu1 %738 }
 0xd87   :  { %v741_v53 = vmul.f32 %v739_v52, %v722_v28 }
 0xd89   :  { %785 = vrot.lane.b32.xlu1 %v741_v53, %s1415_s30 }
 0xdf5   :  { %v782_v24 = vpop.permute.xlu0 %781 }
 0xdfb   :  { %v786_v55 = vpop.permute.xlu1 %785 }
 0xdfc   :  { %v788_v57 = vsel %vm171_vm6, %v782_v24, %v786_v55 }
 0xdfd   :  { %v789_v58 = vpack.c.bf16 %v788_v57, %v788_v57  ;;  %v1786_v57 = vld [vmem:[%s1832_s4] ss:$0 sm:$0xff] }
 0xdff   :  { %1222 = vmatmul.msk.bf16.vlgmr.msrb.gmra.mxu2 %vm214_vm7, %v789_v58  ;;  %1223 = vmatmul.msk.bf16.vlgmr.msrb.gmra.mxu3 %vm214_vm7, %v789_v58 }
 0xe82   :  { %v802_v48 = vpop.f32.mrf.mxu2  ;;  %v815_v60 = vpop.f32.mrf.mxu3 }
 0xe83   :  { %v819_v54 = vadd.f32 %v1602_v56, %v802_v48  ;;  %v857_v61 = vadd.f32 %v815_v60, %v125_v59 }
 0xe85   :  { %1343 = vtanh.f32 %v819_v54  ;;  %v1224_v2 = vmul.f32 -1.442695, %v819_v54  ;;  %v1225_v29 = vmul.f32 -1.442695, %v857_v61 }
 0xe86   :  { %1345 = vtanh.f32 %v857_v61 }
 0xe87   :  { %1347 = vpow2.f32 %v1224_v2 }
 0xe8a   :  { %v804_v62 = vpop.f32.mrf.mxu2  ;;  %v817_v63 = vpop.f32.mrf.mxu3 }
 0xe8b   :  { %v1344_v0 = vpop.eup %1343 }
 0xe8c   :  { %v1346_v1 = vpop.eup %1345  ;;  %842 = vrot.lane.b32.xlu2 %v1344_v0, %s1413_s1 }
 0xe8d   :  { %880 = vrot.lane.b32.xlu0 %v1346_v1, %s1413_s1  ;;  %v1348_v4 = vpop.eup %1347 }
 0xe8e   :  { %v823_v5 = vadd.f32 1.0, %v1348_v4 }
 0xe90   :  { %1349 = vrcp.f32 %v823_v5  ;;  %v835_v42 = vand.u32 2147483648, %v823_v5  ;;  %vm829_vm10 = vweird.f32 %v823_v5  ;;  %v833_v43 = vand.u32 2147483647, %v823_v5 }
 0xe91   :  { %1351 = vpow2.f32 %v1225_v29 }
 0xe92   :  { %v836_v51 = vor.u32 1.1754944e-38, %v835_v42  ;;  %vm834_vm12 = vcmp.eq.f32.partialorder %v833_v43, 8.507059e+37 }
 0xe96   :  { %v1350_v33 = vpop.eup %1349 }
 0xe97   :  { %v825_v6 = vmul.f32 %v1350_v33, %v823_v5  ;;  %v1352_v7 = vpop.eup %1351  ;;  %vm830_vm9 = vweird.f32 %v1350_v33 }
 0xe98   :  { %v861_v3 = vadd.f32 1.0, %v1352_v7  ;;  %vm831_vm11 = vmor %vm829_vm10, %vm830_vm9 }
 0xe99   :  { %v826_v56 = vsub.f32 1.0, %v825_v6 }
 0xe9a   :  { %1353 = vrcp.f32 %v861_v3  ;;  %v873_v16 = vand.u32 2147483648, %v861_v3  ;;  %vm867_vm14 = vweird.f32 %v861_v3  ;;  %v871_v17 = vand.u32 2147483647, %v861_v3 }
 0xe9b   :  { %v827_v37 = vmul.f32 %v1350_v33, %v826_v56 }
 0xe9c   :  { %v874_v19 = vor.u32 1.1754944e-38, %v873_v16  ;;  %vm872_vm0 = vcmp.eq.f32.partialorder %v871_v17, 8.507059e+37 }
 0xe9d   :  { %v828_v36 = vadd.f32 %v1350_v33, %v827_v37 }
 0xe9f   :  { %v832_v49 = vsel %vm831_vm11, %v1350_v33, %v828_v36 }
 0xea0   :  { %v837_v9 = vsel %vm834_vm12, %v836_v51, %v832_v49  ;;  %v1354_v11 = vpop.eup %1353 }
 0xea1   :  { %v863_v12 = vmul.f32 %v1354_v11, %v861_v3  ;;  %vm868_vm13 = vweird.f32 %v1354_v11  ;;  %v840_v23 = vmul.f32 %v837_v9, %v1734_v34 }
 0xea2   :  { %vm869_vm15 = vmor %vm867_vm14, %vm868_vm13 }
 0xea3   :  { %v864_v13 = vsub.f32 1.0, %v863_v12 }
 0xea5   :  { %v865_v14 = vmul.f32 %v1354_v11, %v864_v13 }
 0xea7   :  { %v866_v15 = vadd.f32 %v1354_v11, %v865_v14 }
 0xea9   :  { %v870_v18 = vsel %vm869_vm15, %v1354_v11, %v866_v15  ;;  %vm1107_vm15 = vcmask 7168  }
 0xeaa   :  { %v875_v21 = vsel %vm872_vm0, %v874_v19, %v870_v18  ;;  %vm1138_vm0 = vcmask 0  }
 0xeab   :  { %v878_v25 = vmul.f32 %v875_v21, %v1739_v40  ;;  %v54_v40 = vld [vmem:[%s1828_s0 + $0x38] sm:$0xff] }
 0xeac   :  { %1168 = vmatmul.msk.f32.gmra.mxu0 %vm60_vm1, %v54_v40 }
 0xee6   :  { %v843_v8 = vpop.permute.xlu2 %842 }
 0xee7   :  { %v845_v10 = vmul.f32 %v843_v8, %v837_v9 }
 0xee9   :  { %847 = vrot.lane.b32.xlu1 %v845_v10, %s1413_s1 }
 0xeff   :  { %v881_v20 = vpop.permute.xlu0 %880 }
 0xf00   :  { %v883_v22 = vmul.f32 %v881_v20, %v875_v21 }
 0xf02   :  { %885 = vrot.lane.b32.xlu2 %v883_v22, %s1413_s1 }
 0xf29   :  { %v127_v53 = vpop.f32.mrf.mxu0 }
 0xf2a   :  { %v128_v45 = vadd.f32 %v1755_v41, %v127_v53 }
 0xf5b   :  { %v848_v26 = vpop.permute.xlu1 %847 }
 0xf5c   :  { %v886_v27 = vpop.permute.xlu2 %885  ;;  %v1765_v28 = vadd.f32 %v848_v26, %v840_v23 }
 0xf5d   :  { %v1767_v30 = vadd.f32 %v886_v27, %v878_v25 }
 0xf5e   :  { %1355 = vtanh.f32 %v1765_v28 }
 0xf5f   :  { %1357 = vtanh.f32 %v1767_v30 }
 0xf64   :  { %v1356_v31 = vpop.eup %1355 }
 0xf65   :  { %v1358_v32 = vpop.eup %1357  ;;  %853 = vrot.lane.b32.xlu0 %v1356_v31, %s1413_s1 }
 0xf66   :  { %891 = vrot.lane.b32.xlu1 %v1358_v32, %s1413_s1 }
 0xfd7   :  { %v854_v35 = vpop.permute.xlu0 %853 }
 0xfd8   :  { %v892_v34 = vpop.permute.xlu1 %891  ;;  %v856_v38 = vmul.f32 %v854_v35, %v837_v9 }
 0xfd9   :  { %v894_v39 = vmul.f32 %v892_v34, %v875_v21 }
 0xfda   :  { %900 = vrot.lane.b32.xlu0 %v856_v38, %s1415_s30 }
 0xfdb   :  { %896 = vrot.lane.b32.xlu2 %v894_v39, %s1414_s18 }
0x1035   :  { %v897_v44 = vpop.permute.xlu2 %896 }
0x104c   :  { %v901_v46 = vpop.permute.xlu0 %900 }
0x104d   :  { %v903_v50 = vsel %vm171_vm6, %v897_v44, %v901_v46 }
0x104e   :  { %v904_v52 = vpack.c.bf16 %v903_v50, %v903_v50 }
0x1050   :  { %1226 = vmatmul.msk.bf16.vlgmr.msrb.gmra.mxu0 %vm214_vm7, %v904_v52  ;;  %1227 = vmatmul.msk.bf16.vlgmr.msra.gmra.mxu1 %vm214_vm7, %v904_v52 }
0x10cd   :  { %v917_v24 = vpop.f32.mrf.mxu0  ;;  %v930_v55 = vpop.f32.mrf.mxu1 }
0x10ce   :  { %v934_v58 = vadd.f32 %v1786_v57, %v917_v24  ;;  %v972_v47 = vadd.f32 %v930_v55, %v128_v45 }
0x10d0   :  { %1359 = vtanh.f32 %v934_v58  ;;  %v1229_v41 = vmul.f32 -1.442695, %v972_v47  ;;  %v1228_v0 = vmul.f32 -1.442695, %v934_v58 }
0x10d1   :  { %1361 = vtanh.f32 %v972_v47 }
0x10d2   :  { %1363 = vpow2.f32 %v1229_v41 }
0x10d5   :  { %v919_v59 = vpop.f32.mrf.mxu0  ;;  %v932_v48 = vpop.f32.mrf.mxu1 }
0x10d6   :  { %v1360_v60 = vpop.eup %1359 }
0x10d7   :  { %v1362_v54 = vpop.eup %1361  ;;  %957 = vrot.lane.b32.xlu1 %v1360_v60, %s1413_s1 }
0x10d8   :  { %995 = vrot.lane.b32.xlu2 %v1362_v54, %s1413_s1  ;;  %v1364_v61 = vpop.eup %1363 }
0x10d9   :  { %v976_v62 = vadd.f32 1.0, %v1364_v61 }
0x10db   :  { %1365 = vrcp.f32 %v976_v62  ;;  %v988_v6 = vand.u32 2147483648, %v976_v62  ;;  %vm982_vm2 = vweird.f32 %v976_v62  ;;  %v986_v56 = vand.u32 2147483647, %v976_v62 }
0x10dc   :  { %1367 = vpow2.f32 %v1228_v0 }
0x10dd   :  { %v989_v7 = vor.u32 1.1754944e-38, %v988_v6  ;;  %vm987_vm4 = vcmp.eq.f32.partialorder %v986_v56, 8.507059e+37  ;;  %v1109_v56 = vlaneseq }
0x10e1   :  { %v1366_v63 = vpop.eup %1365 }
0x10e2   :  { %v978_v1 = vmul.f32 %v1366_v63, %v976_v62  ;;  %v1368_v4 = vpop.eup %1367  ;;  %vm983_vm1 = vweird.f32 %v1366_v63 }
0x10e3   :  { %v938_v33 = vadd.f32 1.0, %v1368_v4  ;;  %vm984_vm3 = vmor %vm982_vm2, %vm983_vm1  ;;  %v1075_v4 = vld [vmem:[%s1833_s5 + $0x8] sm:$0xff] }
0x10e4   :  { %v979_v2 = vsub.f32 1.0, %v978_v1  ;;  %v1077_v1 = vld [vmem:[%s1833_s5 + $0x18] sm:$0xff] }
0x10e5   :  { %1369 = vrcp.f32 %v938_v33  ;;  %v950_v10 = vand.u32 2147483648, %v938_v33  ;;  %vm944_vm8 = vweird.f32 %v938_v33  ;;  %v948_v11 = vand.u32 2147483647, %v938_v33  ;;  %1099 = vmatpush.msra.mxu3 %v1077_v1 }
0x10e6   :  { %v980_v5 = vmul.f32 %v1366_v63, %v979_v2  ;;  %v1076_v2 = vld [vmem:[%s1833_s5 + $0x10] sm:$0xff] }
0x10e7   :  { %v951_v13 = vor.u32 1.1754944e-38, %v950_v10  ;;  %vm949_vm10 = vcmp.eq.f32.partialorder %v948_v11, 8.507059e+37  ;;  %1100 = vmatpush.msra.mxu3 %v1076_v2  ;;  %v1417_v11 = vmov 2.0  }
0x10e8   :  { %v981_v29 = vadd.f32 %v1366_v63, %v980_v5  ;;  %v1074_v5 = vld [vmem:[%s1833_s5] sm:$0xff] }
0x10e9   :  { %1101 = vmatpush.msra.mxu3 %v1075_v4 }
0x10ea   :  { %v985_v37 = vsel %vm984_vm3, %v1366_v63, %v981_v29 }
0x10eb   :  { %v990_v36 = vsel %vm987_vm4, %v989_v7, %v985_v37  ;;  %v1370_v42 = vpop.eup %1369  ;;  %1102 = vmatpush.msra.mxu3 %v1074_v5  ;;  %v1110_v37 = vshrl.u32 %v1109_v56, 7  ;;  %v1254_v7 = vld [vmem:[#allocation2] ss:$0 sm:$0xff] }
0x10ec   :  { %v940_v49 = vmul.f32 %v1370_v42, %v938_v33  ;;  %vm945_vm5 = vweird.f32 %v1370_v42  ;;  %v993_v17 = vmul.f32 %v990_v36, %v1767_v30 }
0x10ed   :  { %vm946_vm9 = vmor %vm944_vm8, %vm945_vm5  ;;  %vm1111_vm14 = vcmp.lt.s32.totalorder %v1110_v37, 2 }
0x10ee   :  { %v941_v51 = vsub.f32 1.0, %v940_v49 }
0x10f0   :  { %v942_v8 = vmul.f32 %v1370_v42, %v941_v51 }
0x10f2   :  { %v943_v9 = vadd.f32 %v1370_v42, %v942_v8 }
0x10f4   :  { %v947_v12 = vsel %vm946_vm9, %v1370_v42, %v943_v9 }
0x10f5   :  { %v952_v15 = vsel %vm949_vm10, %v951_v13, %v947_v12 }
0x10f6   :  { %v955_v21 = vmul.f32 %v952_v15, %v1765_v28 }
0x1132   :  { %v996_v3 = vpop.permute.xlu2 %995 }
0x1133   :  { %v998_v43 = vmul.f32 %v996_v3, %v990_v36 }
0x1135   :  { %1000 = vrot.lane.b32.xlu1 %v998_v43, %s1413_s1  ;;  %v1416_v43 = vmov 0.0  }
0x1136   :  { %v1233_v49 = vsel %vm1111_vm14, 1.0, %v1416_v43 }
0x1149   :  { %v958_v14 = vpop.permute.xlu1 %957 }
0x114a   :  { %v960_v16 = vmul.f32 %v958_v14, %v952_v15 }
0x114c   :  { %962 = vrot.lane.b32.xlu0 %v960_v16, %s1413_s1 }
0x11a7   :  { %v1001_v18 = vpop.permute.xlu1 %1000 }
0x11a8   :  { %v1003_v19 = vadd.f32 %v1001_v18, %v993_v17 }
0x11aa   :  { %1371 = vtanh.f32 %v1003_v19 }
0x11b0   :  { %v1372_v20 = vpop.eup %1371 }
0x11b1   :  { %1006 = vrot.lane.b32.xlu0 %v1372_v20, %s1413_s1 }
0x11be   :  { %v963_v22 = vpop.permute.xlu0 %962 }
0x11bf   :  { %v965_v23 = vadd.f32 %v963_v22, %v955_v21 }
0x11c1   :  { %1373 = vtanh.f32 %v965_v23 }
0x11c7   :  { %v1374_v25 = vpop.eup %1373 }
0x11c8   :  { %968 = vrot.lane.b32.xlu2 %v1374_v25, %s1413_s1 }
0x1222   :  { %v969_v26 = vpop.permute.xlu2 %968 }
0x1223   :  { %v1007_v27 = vpop.permute.xlu0 %1006  ;;  %v971_v31 = vmul.f32 %v969_v26, %v952_v15 }
0x1224   :  { %v1009_v32 = vmul.f32 %v1007_v27, %v990_v36  ;;  %v1114_v36 = vld [vmem:[%s1835_s7] sm:$0xff]  ;;  %s1418_s7 = smov [#allocation3]  }
0x1225   :  { %1015 = vrot.lane.b32.xlu2 %v971_v31, %s1415_s30 }
0x1226   :  { %1011 = vrot.lane.b32.xlu1 %v1009_v32, %s1414_s18 }
0x127f   :  { %v1016_v30 = vpop.permute.xlu2 %1015 }
0x1298   :  { %v1012_v35 = vpop.permute.xlu1 %1011 }
0x1299   :  { %v1018_v34 = vsel %vm171_vm6, %v1012_v35, %v1016_v30 }
0x129a   :  { %v1019_v38 = vpack.c.bf16 %v1018_v34, %v1018_v34 }
0x129c   :  { %1230 = vmatmul.msk.bf16.vlgmr.msra.gmra.mxu2 %vm214_vm7, %v1019_v38 }
0x131f   :  { %v1032_v28 = vpop.f32.mrf.mxu2 }
0x1320   :  { %v1036_v39 = vadd.f32 %v1786_v57, %v1032_v28 }
0x1322   :  { %1375 = vtanh.f32 %v1036_v39  ;;  %v1231_v46 = vmul.f32 -1.442695, %v1036_v39 }
0x1324   :  { %1377 = vpow2.f32 %v1231_v46 }
0x1327   :  { %v1034_v40 = vpop.f32.mrf.mxu2 }
0x1328   :  { %v1376_v44 = vpop.eup %1375 }
0x1329   :  { %1059 = vrot.lane.b32.xlu0 %v1376_v44, %s1413_s1 }
0x132a   :  { %v1378_v50 = vpop.eup %1377 }
0x132b   :  { %v1040_v52 = vadd.f32 1.0, %v1378_v50 }
0x132d   :  { %1379 = vrcp.f32 %v1040_v52  ;;  %v1052_v47 = vand.u32 2147483648, %v1040_v52  ;;  %vm1046_vm7 = vweird.f32 %v1040_v52  ;;  %v1050_v59 = vand.u32 2147483647, %v1040_v52 }
0x132f   :  { %v1053_v48 = vor.u32 1.1754944e-38, %v1052_v47  ;;  %vm1051_vm13 = vcmp.eq.f32.partialorder %v1050_v59, 8.507059e+37 }
0x1333   :  { %v1380_v53 = vpop.eup %1379 }
0x1334   :  { %v1042_v45 = vmul.f32 %v1380_v53, %v1040_v52  ;;  %vm1047_vm11 = vweird.f32 %v1380_v53 }
0x1335   :  { %vm1048_vm12 = vmor %vm1046_vm7, %vm1047_vm11 }
0x1336   :  { %v1043_v24 = vsub.f32 1.0, %v1042_v45 }
0x1338   :  { %v1044_v55 = vmul.f32 %v1380_v53, %v1043_v24 }
0x133a   :  { %v1045_v58 = vadd.f32 %v1380_v53, %v1044_v55 }
0x133c   :  { %v1049_v57 = vsel %vm1048_vm12, %v1380_v53, %v1045_v58 }
0x133d   :  { %v1054_v54 = vsel %vm1051_vm13, %v1053_v48, %v1049_v57 }
0x133e   :  { %v1057_v61 = vmul.f32 %v1054_v54, %v965_v23 }
0x139b   :  { %v1060_v60 = vpop.permute.xlu0 %1059 }
0x139c   :  { %v1062_v41 = vmul.f32 %v1060_v60, %v1054_v54 }
0x139e   :  { %1064 = vrot.lane.b32.xlu1 %v1062_v41, %s1413_s1 }
0x1410   :  { %v1065_v62 = vpop.permute.xlu1 %1064 }
0x1411   :  { %v1067_v63 = vadd.f32 %v1065_v62, %v1057_v61 }
0x1413   :  { %1381 = vtanh.f32 %v1067_v63 }
0x1414   :  { %1383 = vrcp.f32 %v1417_v11 }
0x1419   :  { %v1382_v0 = vpop.eup %1381 }
0x141a   :  { %1070 = vrot.lane.b32.xlu2 %v1382_v0, %s1413_s1  ;;  %v1384_v12 = vpop.eup %1383 }
0x141b   :  { %v1129_v13 = vmul.f32 2.0, %v1384_v12 }
0x141d   :  { %v1130_v14 = vsub.f32 1.0, %v1129_v13 }
0x141f   :  { %v1131_v18 = vmul.f32 %v1384_v12, %v1130_v14 }
0x1421   :  { %v1132_v21 = vadd.f32 %v1384_v12, %v1131_v18 }
0x1474   :  { %v1071_v33 = vpop.permute.xlu2 %1070 }
0x1475   :  { %v1073_v29 = vmul.f32 %v1071_v33, %v1054_v54 }
0x1477   :  { %1083 = vrot.lane.b32.xlu0 %v1073_v29, %s1414_s18 }
0x14e9   :  { %v1084_v6 = vpop.permute.xlu0 %1083 }
0x14ea   :  { %1232 = vmatmul.msk.f32.vlgmr.msra.gmra.mxu3 %vm171_vm6, %v1084_v6  ;;  %vm1133_vm6 = vweird.f32 %v1384_v12 }
0x14eb   :  { %v1134_v25 = vsel %vm1133_vm6, %v1384_v12, %v1132_v21 }
0x156d   :  { %v1104_v3 = vpop.f32.mrf.mxu3 }
0x156e   :  { %v1105_v42 = vadd.f32 %v1254_v7, %v1104_v3 }
0x1570   :  { %v1115_v51 = vsub.f32 %v1105_v42, %v1114_v36  ;;  %1108 = vst.msk [vmem:[%s1836_s8] sm:$0xff] %vm1107_vm15, %v1105_v42  ;;  %s1147_s8 = sshll.u32 %s1418_s7, 4  ;;  %s1148_s8 = int_to_ptr.vmem [resolvable:$true] %s1147_s8 }
0x1572   :  { %v1116_v8 = vmul.f32 %v1233_v49, %v1115_v51 }
0x1574   :  { %v1117_v9 = vmul.f32 %v1116_v8, %v1116_v8 }
0x1576   :  { %v1118_v10 = vsel %vm1107_vm15, %v1117_v9, 0.0 }
0x1577   :  { %1119 = vadd.xlane.f32.xlu1 %v1118_v10 }
0x15ea   :  { %v1120_v15 = vpop.xlane.xlu1 %1119 }
0x15eb   :  { %v1121_v16 = vrot.slane %v1120_v15, 4 }
0x15ed   :  { %v1122_v17 = vadd.f32 %v1121_v16, %v1120_v15 }
0x15ef   :  { %v1123_v19 = vrot.slane %v1122_v17, 2 }
0x15f1   :  { %v1124_v20 = vadd.f32 %v1123_v19, %v1122_v17 }
0x15f3   :  { %v1125_v22 = vrot.slane %v1124_v20, 1 }
0x15f5   :  { %v1126_v23 = vadd.f32 %v1125_v22, %v1124_v20 }
0x15f7   :  { %1242 = vpush %v1126_v23 }
0x15f8   :  { %1244 = vpush %v1134_v25 }
0x1628   :  { %s1243_s18 = spop %1242 }
0x1629   :  { %s1245_s14 = spop %1244 }
0x162a   :  { %s1136_s15 = smul.f32 %s1245_s14, %s1243_s18 }
0x162c   :  { %v1137_v26 = vstv %s1136_s15 }
0x162d   :  { %1139 = vst.msk [vmem:[#allocation3] sm:$0x1] %vm1138_vm0, %v1137_v26 }
0x162e   :  { %1152 = dma.vmem_to_hbm [thread:$0]  %s1148_s8, 16, %s1150_s13, [#allocation4]  }
0x162f   :  { %1411 = dma.done.wait [#allocation4], 16  }
0x1630   :  { %1412 = vsyncadd [#allocation4], 4294967280 }
0x1631   :  { %1159 = vsyncpa [#allocation4], 1 }

</bundles_post_ra>
